<compile_context>
chip_gen: v7x
topology: tpu7x:2x2x1
jax: 0.10.0
libtpu: 0.0.40
codegen_flags: <defaults>
</compile_context>

<pallas_src>
import math
import functools

import jax
import jax.numpy as jnp
from jax.experimental import pallas as pl
from jax.experimental.pallas import tpu as pltpu


# ----------------------------- kernel helpers --------------------------------

def _layernorm(h, w_ref, b_ref, eps=1e-5):
    # f32 elementwise; rsqrt maps to the EUP. (1, C) params broadcast over rows.
    mu = jnp.mean(h, axis=-1, keepdims=True)
    var = jnp.mean((h - mu) ** 2, axis=-1, keepdims=True)
    return (h - mu) * jax.lax.rsqrt(var + eps) * w_ref[...] + b_ref[...]


def _gelu_exact(x):
    # matches F.gelu default (erf formulation); multiply by 1/sqrt(2), no divide
    return x * 0.5 * (1.0 + jax.lax.erf(x * 0.7071067811865476))


# ----------------------------- kernel ----------------------------------------

def block_kernel(
    x_ref,
    ln1w_ref, ln1b_ref,
    wqkv_ref, bqkv_ref, wp_ref, bp_ref,
    ln2w_ref, ln2b_ref,
    w1_ref, b1_ref, w2_ref, b2_ref,
    out_ref,
    y_scr,
    *, n_head, seq_len,
):
    rows, C = x_ref.shape                       # rows = BB * T
    T = seq_len
    bb = rows // T
    hd = C // n_head

    x = x_ref[...]                              # (rows, C) f32

    # ---- attention branch ---------------------------------------------------
    h = _layernorm(x, ln1w_ref, ln1b_ref)
    h16 = h.astype(jnp.bfloat16)

    # Fused QKV projection: one (rows, C) x (C, 3C) bf16 MXU call, f32 accum.
    # The 1/sqrt(hd) scale is folded into the Q columns of wqkv / bqkv.
    qkv = jnp.dot(h16, wqkv_ref[...], preferred_element_type=jnp.float32) \
        + bqkv_ref[...]
    qkv16 = qkv.astype(jnp.bfloat16)

    # causal mask built once, reused by every (batch, head)
    row_ids = jax.lax.broadcasted_iota(jnp.int32, (T, T), 0)
    col_ids = jax.lax.broadcasted_iota(jnp.int32, (T, T), 1)
    causal = row_ids >= col_ids
    neg_big = jnp.float32(-1e30)                # finite; exp underflows to 0

    # TODO(synk): switch to lax.fori_loop(..., unroll=True) for large n_head/BB
    for b in range(bb):
        r0, r1 = b * T, (b + 1) * T
        for hi in range(n_head):
            c0 = hi * hd
            q_h = qkv16[r0:r1, c0:c0 + hd]                    # (T, hd) bf16
            k_h = qkv16[r0:r1, C + c0:C + c0 + hd]
            v_h = qkv16[r0:r1, 2 * C + c0:2 * C + c0 + hd]

            # q @ k^T without an explicit transpose (contract last dims)
            att = jax.lax.dot_general(
                q_h, k_h, (((1,), (1,)), ((), ())),
                preferred_element_type=jnp.float32)           # (T, T) f32
            att = jnp.where(causal, att, neg_big)
            att = att - jnp.max(att, axis=-1, keepdims=True)
            p = jnp.exp(att)
            p = p * pl.reciprocal(jnp.sum(p, axis=-1, keepdims=True))  # exact

            y_h = jnp.dot(p.astype(jnp.bfloat16), v_h,
                          preferred_element_type=jnp.float32)  # (T, hd) f32
            # assemble heads into a (rows, C) slab; single projection later
            y_scr[r0:r1, c0:c0 + hd] = y_h.astype(jnp.bfloat16)

    # One K=C output projection for the whole batch block.
    attn_out = jnp.dot(y_scr[...], wp_ref[...],
                       preferred_element_type=jnp.float32) + bp_ref[...]
    x1 = x + attn_out                                           # residual 1

    # ---- MLP branch ----------------------------------------------------------
    h2 = _layernorm(x1, ln2w_ref, ln2b_ref)
    m = jnp.dot(h2.astype(jnp.bfloat16), w1_ref[...],
                preferred_element_type=jnp.float32) + b1_ref[...]
    m = _gelu_exact(m)                                          # exact erf GELU
    m = jnp.dot(m.astype(jnp.bfloat16), w2_ref[...],
                preferred_element_type=jnp.float32) + b2_ref[...]

    out_ref[...] = x1 + m                                       # residual 2


# ----------------------------- wrapper ----------------------------------------

def prepare_block_params(params, n_head):
    """One-time packing: QKV concat, 1/sqrt(hd) scale fold, bf16 weight cast."""
    C = params["wq"].shape[0]
    hd = C // n_head
    scale = 1.0 / math.sqrt(hd)
    return {
        "ln1_w": params["ln1_w"], "ln1_b": params["ln1_b"],
        "ln2_w": params["ln2_w"], "ln2_b": params["ln2_b"],
        "wqkv": jnp.concatenate(
            [params["wq"] * scale, params["wk"], params["wv"]], axis=1
        ).astype(jnp.bfloat16),                                  # (C, 3C) bf16
        "bqkv": jnp.concatenate(
            [params["bq"] * scale, params["bk"], params["bv"]], axis=1
        ),                                                       # (1, 3C) f32
        "wp": params["wp"].astype(jnp.bfloat16), "bp": params["bp"],
        "w1": params["w1"].astype(jnp.bfloat16), "b1": params["b1"],
        "w2": params["w2"].astype(jnp.bfloat16), "b2": params["b2"],
    }


def _pick_batch_block(B, T, target_rows=256):
    bb = max(1, min(B, max(1, target_rows // T)))
    while B % bb:
        bb -= 1
    return bb


def _transformer_block_impl(x, p, *, n_head):
    B, T, C = x.shape
    BB = _pick_batch_block(B, T)
    rows_blk = BB * T
    x2 = x.reshape(B * T, C)                    # flatten wrapper-side (free, jitted)

    weight_args = [
        p["ln1_w"], p["ln1_b"],
        p["wqkv"], p["bqkv"], p["wp"], p["bp"],
        p["ln2_w"], p["ln2_b"],
        p["w1"], p["b1"], p["w2"], p["b2"],
    ]
    full2d = lambda a: pl.BlockSpec(a.shape, lambda i: (0, 0))

    kernel = functools.partial(block_kernel, n_head=n_head, seq_len=T)

    # advisory cost estimate for the surrounding XLA schedule
    flops = 16 * B * T * C * C + 4 * B * T * T * C
    transcendentals = B * n_head * T * T + 2 * B * T * C
    bytes_accessed = 2 * 4 * B * T * C + 2 * 8 * C * C + 4 * 12 * C

    out2 = pl.pallas_call(
        kernel,
        out_shape=jax.ShapeDtypeStruct((B * T, C), x.dtype),
        grid_spec=pltpu.PrefetchScalarGridSpec(
            num_scalar_prefetch=0,
            grid=(B // BB,),
            in_specs=[pl.BlockSpec((rows_blk, C), lambda i: (i, 0))]
                     + [full2d(a) for a in weight_args],
            out_specs=pl.BlockSpec((rows_blk, C), lambda i: (i, 0)),
            scratch_shapes=[pltpu.VMEM((rows_blk, C), jnp.bfloat16)],
        ),
        compiler_params=pltpu.CompilerParams(
            dimension_semantics=("parallel",),
            vmem_limit_bytes=32 * 1024 * 1024,
        ),
        cost_estimate=pl.CostEstimate(
            flops=flops,
            transcendentals=transcendentals,
            bytes_accessed=bytes_accessed,
        ),
    )(x2, *weight_args)
    return out2.reshape(B, T, C)


transformer_block = jax.jit(_transformer_block_impl, static_argnames=("n_head",))


# ----------------------------- reference (plain JAX) --------------------------

def reference_block(x, params, n_head):
    def ln(h, w, b, eps=1e-5):
        mu = jnp.mean(h, axis=-1, keepdims=True)
        var = jnp.mean((h - mu) ** 2, axis=-1, keepdims=True)
        return (h - mu) / jnp.sqrt(var + eps) * w[0] + b[0]

    B, T, C = x.shape
    hd = C // n_head
    h = ln(x, params["ln1_w"], params["ln1_b"])
    q = h @ params["wq"] + params["bq"][0]
    k = h @ params["wk"] + params["bk"][0]
    v = h @ params["wv"] + params["bv"][0]
    q = q.reshape(B, T, n_head, hd).transpose(0, 2, 1, 3)
    k = k.reshape(B, T, n_head, hd).transpose(0, 2, 1, 3)
    v = v.reshape(B, T, n_head, hd).transpose(0, 2, 1, 3)
    att = jnp.einsum("bhtd,bhsd->bhts", q, k) / math.sqrt(hd)
    mask = jnp.tril(jnp.ones((T, T), bool))
    att = jnp.where(mask[None, None], att, -jnp.inf)
    att = jax.nn.softmax(att, axis=-1)
    y = jnp.einsum("bhts,bhsd->bhtd", att, v)
    y = y.transpose(0, 2, 1, 3).reshape(B, T, C)
    y = y @ params["wp"] + params["bp"][0]
    x1 = x + y
    h2 = ln(x1, params["ln2_w"], params["ln2_b"])
    m = h2 @ params["w1"] + params["b1"][0]
    m = m * 0.5 * (1.0 + jax.lax.erf(m / jnp.sqrt(2.0)))
    m = m @ params["w2"] + params["b2"][0]
    return x1 + m


# ----------------------------- main --------------------------------------------

if __name__ == "__main__":
    B, T, C, H = 2, 8, 32, 4   # batch, seq (block_size), n_embd, n_head

    key = jax.random.PRNGKey(0)
    ks = jax.random.split(key, 13)

    def w(k, shape, scale=0.02):
        return (scale * jax.random.normal(k, shape)).astype(jnp.float32)

    params = {
        # LayerNorm affine params (stored as (1, C) for TPU-friendly 2D layout)
        "ln1_w": jnp.ones((1, C), jnp.float32),
        "ln1_b": jnp.zeros((1, C), jnp.float32),
        "ln2_w": jnp.ones((1, C), jnp.float32),
        "ln2_b": jnp.zeros((1, C), jnp.float32),
        # attention linears, stored pre-transposed as (in, out)
        "wq": w(ks[0], (C, C)), "bq": w(ks[1], (1, C)),
        "wk": w(ks[2], (C, C)), "bk": w(ks[3], (1, C)),
        "wv": w(ks[4], (C, C)), "bv": w(ks[5], (1, C)),
        "wp": w(ks[6], (C, C)), "bp": w(ks[7], (1, C)),
        # MLP: C -> 2C -> C
        "w1": w(ks[8], (C, 2 * C)), "b1": w(ks[9], (1, 2 * C)),
        "w2": w(ks[10], (2 * C, C)), "b2": w(ks[11], (1, C)),
    }

    x = jax.random.normal(ks[12], (B, T, C), jnp.float32)

    packed = prepare_block_params(params, n_head=H)   # one-time weight packing

    out = transformer_block(x, packed, n_head=H)
    out = jax.block_until_ready(out)

    ref = reference_block(x, params, n_head=H)
    # bf16 MXU operands -> relaxed tolerance vs the all-f32 reference
    assert jnp.allclose(out, ref, atol=2e-2, rtol=2e-2), "mismatch vs reference"

    print("KERNEL_OK")
</pallas_src>

<mosaic_0001>
module attributes {stable_mosaic.version = 11 : i64} {
  func.func @block_kernel(%arg0: i32, %arg1: memref<16x32xf32, #tpu.memory_space<vmem>>, %arg2: memref<1x32xf32, #tpu.memory_space<vmem>>, %arg3: memref<1x32xf32, #tpu.memory_space<vmem>>, %arg4: memref<32x96xbf16, #tpu.memory_space<vmem>>, %arg5: memref<1x96xf32, #tpu.memory_space<vmem>>, %arg6: memref<32x32xbf16, #tpu.memory_space<vmem>>, %arg7: memref<1x32xf32, #tpu.memory_space<vmem>>, %arg8: memref<1x32xf32, #tpu.memory_space<vmem>>, %arg9: memref<1x32xf32, #tpu.memory_space<vmem>>, %arg10: memref<32x64xbf16, #tpu.memory_space<vmem>>, %arg11: memref<1x64xf32, #tpu.memory_space<vmem>>, %arg12: memref<64x32xbf16, #tpu.memory_space<vmem>>, %arg13: memref<1x32xf32, #tpu.memory_space<vmem>>, %arg14: memref<16x32xf32, #tpu.memory_space<vmem>>, %arg15: memref<16x32xbf16, #tpu.memory_space<vmem>>) attributes {dimension_semantics = [#tpu.dimension_semantics<parallel>], iteration_bounds = array<i64: 1>, scalar_prefetch = 0 : i64, scratch_operands = 1 : i64, tpu.core_type = #tpu.core_type<tc>, window_params = [{transform_indices = @transform_0, window_bounds = array<i64: 16, 32>}, {pipeline_mode = #tpu.pipeline_mode<synchronous>, transform_indices = @transform_1, window_bounds = array<i64: 1, 32>}, {pipeline_mode = #tpu.pipeline_mode<synchronous>, transform_indices = @transform_2, window_bounds = array<i64: 1, 32>}, {pipeline_mode = #tpu.pipeline_mode<synchronous>, transform_indices = @transform_3, window_bounds = array<i64: 32, 96>}, {pipeline_mode = #tpu.pipeline_mode<synchronous>, transform_indices = @transform_4, window_bounds = array<i64: 1, 96>}, {pipeline_mode = #tpu.pipeline_mode<synchronous>, transform_indices = @transform_5, window_bounds = array<i64: 32, 32>}, {pipeline_mode = #tpu.pipeline_mode<synchronous>, transform_indices = @transform_6, window_bounds = array<i64: 1, 32>}, {pipeline_mode = #tpu.pipeline_mode<synchronous>, transform_indices = @transform_7, window_bounds = array<i64: 1, 32>}, {pipeline_mode = #tpu.pipeline_mode<synchronous>, transform_indices = @transform_8, window_bounds = array<i64: 1, 32>}, {pipeline_mode = #tpu.pipeline_mode<synchronous>, transform_indices = @transform_9, window_bounds = array<i64: 32, 64>}, {pipeline_mode = #tpu.pipeline_mode<synchronous>, transform_indices = @transform_10, window_bounds = array<i64: 1, 64>}, {pipeline_mode = #tpu.pipeline_mode<synchronous>, transform_indices = @transform_11, window_bounds = array<i64: 64, 32>}, {pipeline_mode = #tpu.pipeline_mode<synchronous>, transform_indices = @transform_12, window_bounds = array<i64: 1, 32>}, {transform_indices = @transform_13, window_bounds = array<i64: 16, 32>}]} {
    %c0 = arith.constant 0 : index
    %c0_0 = arith.constant 0 : index
    %0 = vector.load %arg1[%c0, %c0_0] : memref<16x32xf32, #tpu.memory_space<vmem>>, vector<16x32xf32>
    %cst = arith.constant dense<0.000000e+00> : vector<16xf32>
    %1 = vector.multi_reduction <add>, %0, %cst [1] : vector<16x32xf32> to vector<16xf32>
    %2 = vector.shape_cast %1 : vector<16xf32> to vector<16x1xf32>
    %cst_1 = arith.constant 3.200000e+01 : f32
    %3 = vector.broadcast %cst_1 : f32 to vector<16x1xf32>
    %4 = arith.divf %2, %3 : vector<16x1xf32>
    %5 = vector.broadcast %4 : vector<16x1xf32> to vector<16x32xf32>
    %6 = arith.subf %0, %5 : vector<16x32xf32>
    %7 = arith.mulf %6, %6 : vector<16x32xf32>
    %cst_2 = arith.constant dense<0.000000e+00> : vector<16xf32>
    %8 = vector.multi_reduction <add>, %7, %cst_2 [1] : vector<16x32xf32> to vector<16xf32>
    %9 = vector.shape_cast %8 : vector<16xf32> to vector<16x1xf32>
    %cst_3 = arith.constant 3.200000e+01 : f32
    %10 = vector.broadcast %cst_3 : f32 to vector<16x1xf32>
    %11 = arith.divf %9, %10 : vector<16x1xf32>
    %12 = vector.broadcast %4 : vector<16x1xf32> to vector<16x32xf32>
    %13 = arith.subf %0, %12 : vector<16x32xf32>
    %cst_4 = arith.constant 9.99999974E-6 : f32
    %14 = vector.broadcast %cst_4 : f32 to vector<16x1xf32>
    %15 = arith.addf %11, %14 : vector<16x1xf32>
    %16 = math.rsqrt %15 : vector<16x1xf32>
    %17 = vector.broadcast %16 : vector<16x1xf32> to vector<16x32xf32>
    %18 = arith.mulf %13, %17 : vector<16x32xf32>
    %c0_5 = arith.constant 0 : index
    %c0_6 = arith.constant 0 : index
    %19 = vector.load %arg2[%c0_5, %c0_6] : memref<1x32xf32, #tpu.memory_space<vmem>>, vector<1x32xf32>
    %20 = vector.broadcast %19 : vector<1x32xf32> to vector<16x32xf32>
    %21 = arith.mulf %18, %20 : vector<16x32xf32>
    %c0_7 = arith.constant 0 : index
    %c0_8 = arith.constant 0 : index
    %22 = vector.load %arg3[%c0_7, %c0_8] : memref<1x32xf32, #tpu.memory_space<vmem>>, vector<1x32xf32>
    %23 = vector.broadcast %22 : vector<1x32xf32> to vector<16x32xf32>
    %24 = arith.addf %21, %23 : vector<16x32xf32>
    %25 = arith.truncf %24 : vector<16x32xf32> to vector<16x32xbf16>
    %c0_9 = arith.constant 0 : index
    %c0_10 = arith.constant 0 : index
    %26 = vector.load %arg4[%c0_9, %c0_10] : memref<32x96xbf16, #tpu.memory_space<vmem>>, vector<32x96xbf16>
    %cst_11 = arith.constant dense<0.000000e+00> : vector<16x96xf32>
    %27 = tpu.matmul %25, %26, %cst_11 {dimension_numbers = #tpu.dot_dimension_numbers<[1], [0], [0], [1], [0, 0, 1, 1], [], []>} : vector<16x32xbf16>, vector<32x96xbf16>, vector<16x96xf32> -> vector<16x96xf32>
    %c0_12 = arith.constant 0 : index
    %c0_13 = arith.constant 0 : index
    %28 = vector.load %arg5[%c0_12, %c0_13] : memref<1x96xf32, #tpu.memory_space<vmem>>, vector<1x96xf32>
    %29 = vector.broadcast %28 : vector<1x96xf32> to vector<16x96xf32>
    %30 = arith.addf %27, %29 : vector<16x96xf32>
    %31 = arith.truncf %30 : vector<16x96xf32> to vector<16x96xbf16>
    %32 = tpu.iota {dimensions = array<i32: 0>} : vector<8x8xi32>
    %33 = tpu.iota {dimensions = array<i32: 1>} : vector<8x8xi32>
    %34 = arith.cmpi sge, %32, %33 : vector<8x8xi32>
    %35 = vector.extract_strided_slice %31 {offsets = [0, 0], sizes = [8, 8], strides = [1, 1]} : vector<16x96xbf16> to vector<8x8xbf16>
    %36 = vector.extract_strided_slice %31 {offsets = [0, 32], sizes = [8, 8], strides = [1, 1]} : vector<16x96xbf16> to vector<8x8xbf16>
    %37 = vector.extract_strided_slice %31 {offsets = [0, 64], sizes = [8, 8], strides = [1, 1]} : vector<16x96xbf16> to vector<8x8xbf16>
    %cst_14 = arith.constant dense<0.000000e+00> : vector<8x8xf32>
    %38 = tpu.matmul %35, %36, %cst_14 {dimension_numbers = #tpu.dot_dimension_numbers<[1], [1], [0], [0], [0, 0, 1, 0], [], []>} : vector<8x8xbf16>, vector<8x8xbf16>, vector<8x8xf32> -> vector<8x8xf32>
    %cst_15 = arith.constant -1.000000e+30 : f32
    %39 = vector.broadcast %cst_15 : f32 to vector<8x8xf32>
    %40 = arith.select %34, %38, %39 : vector<8x8xi1>, vector<8x8xf32>
    %cst_16 = arith.constant dense<0xFF800000> : vector<8xf32>
    %41 = vector.multi_reduction <maximumf>, %40, %cst_16 [1] : vector<8x8xf32> to vector<8xf32>
    %42 = vector.shape_cast %41 : vector<8xf32> to vector<8x1xf32>
    %43 = vector.broadcast %42 : vector<8x1xf32> to vector<8x8xf32>
    %44 = arith.subf %40, %43 : vector<8x8xf32>
    %45 = math.exp %44 : vector<8x8xf32>
    %cst_17 = arith.constant dense<0.000000e+00> : vector<8xf32>
    %46 = vector.multi_reduction <add>, %45, %cst_17 [1] : vector<8x8xf32> to vector<8xf32>
    %47 = vector.shape_cast %46 : vector<8xf32> to vector<8x1xf32>
    %48 = tpu.reciprocal %47 : vector<8x1xf32> -> vector<8x1xf32>
    %49 = vector.broadcast %48 : vector<8x1xf32> to vector<8x8xf32>
    %50 = arith.mulf %45, %49 : vector<8x8xf32>
    %51 = arith.truncf %50 : vector<8x8xf32> to vector<8x8xbf16>
    %cst_18 = arith.constant dense<0.000000e+00> : vector<8x8xf32>
    %52 = tpu.matmul %51, %37, %cst_18 {dimension_numbers = #tpu.dot_dimension_numbers<[1], [0], [0], [1], [0, 0, 1, 1], [], []>} : vector<8x8xbf16>, vector<8x8xbf16>, vector<8x8xf32> -> vector<8x8xf32>
    %53 = arith.truncf %52 : vector<8x8xf32> to vector<8x8xbf16>
    %c0_19 = arith.constant 0 : index
    %c0_20 = arith.constant 0 : index
    %54 = vector.load %arg15[%c0_19, %c0_20] : memref<16x32xbf16, #tpu.memory_space<vmem>>, vector<8x8xbf16>
    tpu.vector_store %arg15[%c0_19, %c0_20], %53 {strides = array<i32>} : memref<16x32xbf16, #tpu.memory_space<vmem>>, vector<8x8xbf16>,
    %55 = vector.extract_strided_slice %31 {offsets = [0, 8], sizes = [8, 8], strides = [1, 1]} : vector<16x96xbf16> to vector<8x8xbf16>
    %56 = vector.extract_strided_slice %31 {offsets = [0, 40], sizes = [8, 8], strides = [1, 1]} : vector<16x96xbf16> to vector<8x8xbf16>
    %57 = vector.extract_strided_slice %31 {offsets = [0, 72], sizes = [8, 8], strides = [1, 1]} : vector<16x96xbf16> to vector<8x8xbf16>
    %cst_21 = arith.constant dense<0.000000e+00> : vector<8x8xf32>
    %58 = tpu.matmul %55, %56, %cst_21 {dimension_numbers = #tpu.dot_dimension_numbers<[1], [1], [0], [0], [0, 0, 1, 0], [], []>} : vector<8x8xbf16>, vector<8x8xbf16>, vector<8x8xf32> -> vector<8x8xf32>
    %cst_22 = arith.constant -1.000000e+30 : f32
    %59 = vector.broadcast %cst_22 : f32 to vector<8x8xf32>
    %60 = arith.select %34, %58, %59 : vector<8x8xi1>, vector<8x8xf32>
    %cst_23 = arith.constant dense<0xFF800000> : vector<8xf32>
    %61 = vector.multi_reduction <maximumf>, %60, %cst_23 [1] : vector<8x8xf32> to vector<8xf32>
    %62 = vector.shape_cast %61 : vector<8xf32> to vector<8x1xf32>
    %63 = vector.broadcast %62 : vector<8x1xf32> to vector<8x8xf32>
    %64 = arith.subf %60, %63 : vector<8x8xf32>
    %65 = math.exp %64 : vector<8x8xf32>
    %cst_24 = arith.constant dense<0.000000e+00> : vector<8xf32>
    %66 = vector.multi_reduction <add>, %65, %cst_24 [1] : vector<8x8xf32> to vector<8xf32>
    %67 = vector.shape_cast %66 : vector<8xf32> to vector<8x1xf32>
    %68 = tpu.reciprocal %67 : vector<8x1xf32> -> vector<8x1xf32>
    %69 = vector.broadcast %68 : vector<8x1xf32> to vector<8x8xf32>
    %70 = arith.mulf %65, %69 : vector<8x8xf32>
    %71 = arith.truncf %70 : vector<8x8xf32> to vector<8x8xbf16>
    %cst_25 = arith.constant dense<0.000000e+00> : vector<8x8xf32>
    %72 = tpu.matmul %71, %57, %cst_25 {dimension_numbers = #tpu.dot_dimension_numbers<[1], [0], [0], [1], [0, 0, 1, 1], [], []>} : vector<8x8xbf16>, vector<8x8xbf16>, vector<8x8xf32> -> vector<8x8xf32>
    %73 = arith.truncf %72 : vector<8x8xf32> to vector<8x8xbf16>
    %c0_26 = arith.constant 0 : index
    %c8 = arith.constant 8 : index
    %74 = vector.load %arg15[%c0_26, %c8] : memref<16x32xbf16, #tpu.memory_space<vmem>>, vector<8x8xbf16>
    tpu.vector_store %arg15[%c0_26, %c8], %73 {strides = array<i32>} : memref<16x32xbf16, #tpu.memory_space<vmem>>, vector<8x8xbf16>,
    %75 = vector.extract_strided_slice %31 {offsets = [0, 16], sizes = [8, 8], strides = [1, 1]} : vector<16x96xbf16> to vector<8x8xbf16>
    %76 = vector.extract_strided_slice %31 {offsets = [0, 48], sizes = [8, 8], strides = [1, 1]} : vector<16x96xbf16> to vector<8x8xbf16>
    %77 = vector.extract_strided_slice %31 {offsets = [0, 80], sizes = [8, 8], strides = [1, 1]} : vector<16x96xbf16> to vector<8x8xbf16>
    %cst_27 = arith.constant dense<0.000000e+00> : vector<8x8xf32>
    %78 = tpu.matmul %75, %76, %cst_27 {dimension_numbers = #tpu.dot_dimension_numbers<[1], [1], [0], [0], [0, 0, 1, 0], [], []>} : vector<8x8xbf16>, vector<8x8xbf16>, vector<8x8xf32> -> vector<8x8xf32>
    %cst_28 = arith.constant -1.000000e+30 : f32
    %79 = vector.broadcast %cst_28 : f32 to vector<8x8xf32>
    %80 = arith.select %34, %78, %79 : vector<8x8xi1>, vector<8x8xf32>
    %cst_29 = arith.constant dense<0xFF800000> : vector<8xf32>
    %81 = vector.multi_reduction <maximumf>, %80, %cst_29 [1] : vector<8x8xf32> to vector<8xf32>
    %82 = vector.shape_cast %81 : vector<8xf32> to vector<8x1xf32>
    %83 = vector.broadcast %82 : vector<8x1xf32> to vector<8x8xf32>
    %84 = arith.subf %80, %83 : vector<8x8xf32>
    %85 = math.exp %84 : vector<8x8xf32>
    %cst_30 = arith.constant dense<0.000000e+00> : vector<8xf32>
    %86 = vector.multi_reduction <add>, %85, %cst_30 [1] : vector<8x8xf32> to vector<8xf32>
    %87 = vector.shape_cast %86 : vector<8xf32> to vector<8x1xf32>
    %88 = tpu.reciprocal %87 : vector<8x1xf32> -> vector<8x1xf32>
    %89 = vector.broadcast %88 : vector<8x1xf32> to vector<8x8xf32>
    %90 = arith.mulf %85, %89 : vector<8x8xf32>
    %91 = arith.truncf %90 : vector<8x8xf32> to vector<8x8xbf16>
    %cst_31 = arith.constant dense<0.000000e+00> : vector<8x8xf32>
    %92 = tpu.matmul %91, %77, %cst_31 {dimension_numbers = #tpu.dot_dimension_numbers<[1], [0], [0], [1], [0, 0, 1, 1], [], []>} : vector<8x8xbf16>, vector<8x8xbf16>, vector<8x8xf32> -> vector<8x8xf32>
    %93 = arith.truncf %92 : vector<8x8xf32> to vector<8x8xbf16>
    %c0_32 = arith.constant 0 : index
    %c16 = arith.constant 16 : index
    %94 = vector.load %arg15[%c0_32, %c16] : memref<16x32xbf16, #tpu.memory_space<vmem>>, vector<8x8xbf16>
    tpu.vector_store %arg15[%c0_32, %c16], %93 {strides = array<i32>} : memref<16x32xbf16, #tpu.memory_space<vmem>>, vector<8x8xbf16>,
    %95 = vector.extract_strided_slice %31 {offsets = [0, 24], sizes = [8, 8], strides = [1, 1]} : vector<16x96xbf16> to vector<8x8xbf16>
    %96 = vector.extract_strided_slice %31 {offsets = [0, 56], sizes = [8, 8], strides = [1, 1]} : vector<16x96xbf16> to vector<8x8xbf16>
    %97 = vector.extract_strided_slice %31 {offsets = [0, 88], sizes = [8, 8], strides = [1, 1]} : vector<16x96xbf16> to vector<8x8xbf16>
    %cst_33 = arith.constant dense<0.000000e+00> : vector<8x8xf32>
    %98 = tpu.matmul %95, %96, %cst_33 {dimension_numbers = #tpu.dot_dimension_numbers<[1], [1], [0], [0], [0, 0, 1, 0], [], []>} : vector<8x8xbf16>, vector<8x8xbf16>, vector<8x8xf32> -> vector<8x8xf32>
    %cst_34 = arith.constant -1.000000e+30 : f32
    %99 = vector.broadcast %cst_34 : f32 to vector<8x8xf32>
    %100 = arith.select %34, %98, %99 : vector<8x8xi1>, vector<8x8xf32>
    %cst_35 = arith.constant dense<0xFF800000> : vector<8xf32>
    %101 = vector.multi_reduction <maximumf>, %100, %cst_35 [1] : vector<8x8xf32> to vector<8xf32>
    %102 = vector.shape_cast %101 : vector<8xf32> to vector<8x1xf32>
    %103 = vector.broadcast %102 : vector<8x1xf32> to vector<8x8xf32>
    %104 = arith.subf %100, %103 : vector<8x8xf32>
    %105 = math.exp %104 : vector<8x8xf32>
    %cst_36 = arith.constant dense<0.000000e+00> : vector<8xf32>
    %106 = vector.multi_reduction <add>, %105, %cst_36 [1] : vector<8x8xf32> to vector<8xf32>
    %107 = vector.shape_cast %106 : vector<8xf32> to vector<8x1xf32>
    %108 = tpu.reciprocal %107 : vector<8x1xf32> -> vector<8x1xf32>
    %109 = vector.broadcast %108 : vector<8x1xf32> to vector<8x8xf32>
    %110 = arith.mulf %105, %109 : vector<8x8xf32>
    %111 = arith.truncf %110 : vector<8x8xf32> to vector<8x8xbf16>
    %cst_37 = arith.constant dense<0.000000e+00> : vector<8x8xf32>
    %112 = tpu.matmul %111, %97, %cst_37 {dimension_numbers = #tpu.dot_dimension_numbers<[1], [0], [0], [1], [0, 0, 1, 1], [], []>} : vector<8x8xbf16>, vector<8x8xbf16>, vector<8x8xf32> -> vector<8x8xf32>
    %113 = arith.truncf %112 : vector<8x8xf32> to vector<8x8xbf16>
    %c0_38 = arith.constant 0 : index
    %c24 = arith.constant 24 : index
    %114 = vector.load %arg15[%c0_38, %c24] : memref<16x32xbf16, #tpu.memory_space<vmem>>, vector<8x8xbf16>
    tpu.vector_store %arg15[%c0_38, %c24], %113 {strides = array<i32>} : memref<16x32xbf16, #tpu.memory_space<vmem>>, vector<8x8xbf16>,
    %115 = vector.extract_strided_slice %31 {offsets = [8, 0], sizes = [8, 8], strides = [1, 1]} : vector<16x96xbf16> to vector<8x8xbf16>
    %116 = vector.extract_strided_slice %31 {offsets = [8, 32], sizes = [8, 8], strides = [1, 1]} : vector<16x96xbf16> to vector<8x8xbf16>
    %117 = vector.extract_strided_slice %31 {offsets = [8, 64], sizes = [8, 8], strides = [1, 1]} : vector<16x96xbf16> to vector<8x8xbf16>
    %cst_39 = arith.constant dense<0.000000e+00> : vector<8x8xf32>
    %118 = tpu.matmul %115, %116, %cst_39 {dimension_numbers = #tpu.dot_dimension_numbers<[1], [1], [0], [0], [0, 0, 1, 0], [], []>} : vector<8x8xbf16>, vector<8x8xbf16>, vector<8x8xf32> -> vector<8x8xf32>
    %cst_40 = arith.constant -1.000000e+30 : f32
    %119 = vector.broadcast %cst_40 : f32 to vector<8x8xf32>
    %120 = arith.select %34, %118, %119 : vector<8x8xi1>, vector<8x8xf32>
    %cst_41 = arith.constant dense<0xFF800000> : vector<8xf32>
    %121 = vector.multi_reduction <maximumf>, %120, %cst_41 [1] : vector<8x8xf32> to vector<8xf32>
    %122 = vector.shape_cast %121 : vector<8xf32> to vector<8x1xf32>
    %123 = vector.broadcast %122 : vector<8x1xf32> to vector<8x8xf32>
    %124 = arith.subf %120, %123 : vector<8x8xf32>
    %125 = math.exp %124 : vector<8x8xf32>
    %cst_42 = arith.constant dense<0.000000e+00> : vector<8xf32>
    %126 = vector.multi_reduction <add>, %125, %cst_42 [1] : vector<8x8xf32> to vector<8xf32>
    %127 = vector.shape_cast %126 : vector<8xf32> to vector<8x1xf32>
    %128 = tpu.reciprocal %127 : vector<8x1xf32> -> vector<8x1xf32>
    %129 = vector.broadcast %128 : vector<8x1xf32> to vector<8x8xf32>
    %130 = arith.mulf %125, %129 : vector<8x8xf32>
    %131 = arith.truncf %130 : vector<8x8xf32> to vector<8x8xbf16>
    %cst_43 = arith.constant dense<0.000000e+00> : vector<8x8xf32>
    %132 = tpu.matmul %131, %117, %cst_43 {dimension_numbers = #tpu.dot_dimension_numbers<[1], [0], [0], [1], [0, 0, 1, 1], [], []>} : vector<8x8xbf16>, vector<8x8xbf16>, vector<8x8xf32> -> vector<8x8xf32>
    %133 = arith.truncf %132 : vector<8x8xf32> to vector<8x8xbf16>
    %c8_44 = arith.constant 8 : index
    %c0_45 = arith.constant 0 : index
    %134 = vector.load %arg15[%c8_44, %c0_45] : memref<16x32xbf16, #tpu.memory_space<vmem>>, vector<8x8xbf16>
    tpu.vector_store %arg15[%c8_44, %c0_45], %133 {strides = array<i32>} : memref<16x32xbf16, #tpu.memory_space<vmem>>, vector<8x8xbf16>,
    %135 = vector.extract_strided_slice %31 {offsets = [8, 8], sizes = [8, 8], strides = [1, 1]} : vector<16x96xbf16> to vector<8x8xbf16>
    %136 = vector.extract_strided_slice %31 {offsets = [8, 40], sizes = [8, 8], strides = [1, 1]} : vector<16x96xbf16> to vector<8x8xbf16>
    %137 = vector.extract_strided_slice %31 {offsets = [8, 72], sizes = [8, 8], strides = [1, 1]} : vector<16x96xbf16> to vector<8x8xbf16>
    %cst_46 = arith.constant dense<0.000000e+00> : vector<8x8xf32>
    %138 = tpu.matmul %135, %136, %cst_46 {dimension_numbers = #tpu.dot_dimension_numbers<[1], [1], [0], [0], [0, 0, 1, 0], [], []>} : vector<8x8xbf16>, vector<8x8xbf16>, vector<8x8xf32> -> vector<8x8xf32>
    %cst_47 = arith.constant -1.000000e+30 : f32
    %139 = vector.broadcast %cst_47 : f32 to vector<8x8xf32>
    %140 = arith.select %34, %138, %139 : vector<8x8xi1>, vector<8x8xf32>
    %cst_48 = arith.constant dense<0xFF800000> : vector<8xf32>
    %141 = vector.multi_reduction <maximumf>, %140, %cst_48 [1] : vector<8x8xf32> to vector<8xf32>
    %142 = vector.shape_cast %141 : vector<8xf32> to vector<8x1xf32>
    %143 = vector.broadcast %142 : vector<8x1xf32> to vector<8x8xf32>
    %144 = arith.subf %140, %143 : vector<8x8xf32>
    %145 = math.exp %144 : vector<8x8xf32>
    %cst_49 = arith.constant dense<0.000000e+00> : vector<8xf32>
    %146 = vector.multi_reduction <add>, %145, %cst_49 [1] : vector<8x8xf32> to vector<8xf32>
    %147 = vector.shape_cast %146 : vector<8xf32> to vector<8x1xf32>
    %148 = tpu.reciprocal %147 : vector<8x1xf32> -> vector<8x1xf32>
    %149 = vector.broadcast %148 : vector<8x1xf32> to vector<8x8xf32>
    %150 = arith.mulf %145, %149 : vector<8x8xf32>
    %151 = arith.truncf %150 : vector<8x8xf32> to vector<8x8xbf16>
    %cst_50 = arith.constant dense<0.000000e+00> : vector<8x8xf32>
    %152 = tpu.matmul %151, %137, %cst_50 {dimension_numbers = #tpu.dot_dimension_numbers<[1], [0], [0], [1], [0, 0, 1, 1], [], []>} : vector<8x8xbf16>, vector<8x8xbf16>, vector<8x8xf32> -> vector<8x8xf32>
    %153 = arith.truncf %152 : vector<8x8xf32> to vector<8x8xbf16>
    %c8_51 = arith.constant 8 : index
    %c8_52 = arith.constant 8 : index
    %154 = vector.load %arg15[%c8_51, %c8_52] : memref<16x32xbf16, #tpu.memory_space<vmem>>, vector<8x8xbf16>
    tpu.vector_store %arg15[%c8_51, %c8_52], %153 {strides = array<i32>} : memref<16x32xbf16, #tpu.memory_space<vmem>>, vector<8x8xbf16>,
    %155 = vector.extract_strided_slice %31 {offsets = [8, 16], sizes = [8, 8], strides = [1, 1]} : vector<16x96xbf16> to vector<8x8xbf16>
    %156 = vector.extract_strided_slice %31 {offsets = [8, 48], sizes = [8, 8], strides = [1, 1]} : vector<16x96xbf16> to vector<8x8xbf16>
    %157 = vector.extract_strided_slice %31 {offsets = [8, 80], sizes = [8, 8], strides = [1, 1]} : vector<16x96xbf16> to vector<8x8xbf16>
    %cst_53 = arith.constant dense<0.000000e+00> : vector<8x8xf32>
    %158 = tpu.matmul %155, %156, %cst_53 {dimension_numbers = #tpu.dot_dimension_numbers<[1], [1], [0], [0], [0, 0, 1, 0], [], []>} : vector<8x8xbf16>, vector<8x8xbf16>, vector<8x8xf32> -> vector<8x8xf32>
    %cst_54 = arith.constant -1.000000e+30 : f32
    %159 = vector.broadcast %cst_54 : f32 to vector<8x8xf32>
    %160 = arith.select %34, %158, %159 : vector<8x8xi1>, vector<8x8xf32>
    %cst_55 = arith.constant dense<0xFF800000> : vector<8xf32>
    %161 = vector.multi_reduction <maximumf>, %160, %cst_55 [1] : vector<8x8xf32> to vector<8xf32>
    %162 = vector.shape_cast %161 : vector<8xf32> to vector<8x1xf32>
    %163 = vector.broadcast %162 : vector<8x1xf32> to vector<8x8xf32>
    %164 = arith.subf %160, %163 : vector<8x8xf32>
    %165 = math.exp %164 : vector<8x8xf32>
    %cst_56 = arith.constant dense<0.000000e+00> : vector<8xf32>
    %166 = vector.multi_reduction <add>, %165, %cst_56 [1] : vector<8x8xf32> to vector<8xf32>
    %167 = vector.shape_cast %166 : vector<8xf32> to vector<8x1xf32>
    %168 = tpu.reciprocal %167 : vector<8x1xf32> -> vector<8x1xf32>
    %169 = vector.broadcast %168 : vector<8x1xf32> to vector<8x8xf32>
    %170 = arith.mulf %165, %169 : vector<8x8xf32>
    %171 = arith.truncf %170 : vector<8x8xf32> to vector<8x8xbf16>
    %cst_57 = arith.constant dense<0.000000e+00> : vector<8x8xf32>
    %172 = tpu.matmul %171, %157, %cst_57 {dimension_numbers = #tpu.dot_dimension_numbers<[1], [0], [0], [1], [0, 0, 1, 1], [], []>} : vector<8x8xbf16>, vector<8x8xbf16>, vector<8x8xf32> -> vector<8x8xf32>
    %173 = arith.truncf %172 : vector<8x8xf32> to vector<8x8xbf16>
    %c8_58 = arith.constant 8 : index
    %c16_59 = arith.constant 16 : index
    %174 = vector.load %arg15[%c8_58, %c16_59] : memref<16x32xbf16, #tpu.memory_space<vmem>>, vector<8x8xbf16>
    tpu.vector_store %arg15[%c8_58, %c16_59], %173 {strides = array<i32>} : memref<16x32xbf16, #tpu.memory_space<vmem>>, vector<8x8xbf16>,
    %175 = vector.extract_strided_slice %31 {offsets = [8, 24], sizes = [8, 8], strides = [1, 1]} : vector<16x96xbf16> to vector<8x8xbf16>
    %176 = vector.extract_strided_slice %31 {offsets = [8, 56], sizes = [8, 8], strides = [1, 1]} : vector<16x96xbf16> to vector<8x8xbf16>
    %177 = vector.extract_strided_slice %31 {offsets = [8, 88], sizes = [8, 8], strides = [1, 1]} : vector<16x96xbf16> to vector<8x8xbf16>
    %cst_60 = arith.constant dense<0.000000e+00> : vector<8x8xf32>
    %178 = tpu.matmul %175, %176, %cst_60 {dimension_numbers = #tpu.dot_dimension_numbers<[1], [1], [0], [0], [0, 0, 1, 0], [], []>} : vector<8x8xbf16>, vector<8x8xbf16>, vector<8x8xf32> -> vector<8x8xf32>
    %cst_61 = arith.constant -1.000000e+30 : f32
    %179 = vector.broadcast %cst_61 : f32 to vector<8x8xf32>
    %180 = arith.select %34, %178, %179 : vector<8x8xi1>, vector<8x8xf32>
    %cst_62 = arith.constant dense<0xFF800000> : vector<8xf32>
    %181 = vector.multi_reduction <maximumf>, %180, %cst_62 [1] : vector<8x8xf32> to vector<8xf32>
    %182 = vector.shape_cast %181 : vector<8xf32> to vector<8x1xf32>
    %183 = vector.broadcast %182 : vector<8x1xf32> to vector<8x8xf32>
    %184 = arith.subf %180, %183 : vector<8x8xf32>
    %185 = math.exp %184 : vector<8x8xf32>
    %cst_63 = arith.constant dense<0.000000e+00> : vector<8xf32>
    %186 = vector.multi_reduction <add>, %185, %cst_63 [1] : vector<8x8xf32> to vector<8xf32>
    %187 = vector.shape_cast %186 : vector<8xf32> to vector<8x1xf32>
    %188 = tpu.reciprocal %187 : vector<8x1xf32> -> vector<8x1xf32>
    %189 = vector.broadcast %188 : vector<8x1xf32> to vector<8x8xf32>
    %190 = arith.mulf %185, %189 : vector<8x8xf32>
    %191 = arith.truncf %190 : vector<8x8xf32> to vector<8x8xbf16>
    %cst_64 = arith.constant dense<0.000000e+00> : vector<8x8xf32>
    %192 = tpu.matmul %191, %177, %cst_64 {dimension_numbers = #tpu.dot_dimension_numbers<[1], [0], [0], [1], [0, 0, 1, 1], [], []>} : vector<8x8xbf16>, vector<8x8xbf16>, vector<8x8xf32> -> vector<8x8xf32>
    %193 = arith.truncf %192 : vector<8x8xf32> to vector<8x8xbf16>
    %c8_65 = arith.constant 8 : index
    %c24_66 = arith.constant 24 : index
    %194 = vector.load %arg15[%c8_65, %c24_66] : memref<16x32xbf16, #tpu.memory_space<vmem>>, vector<8x8xbf16>
    tpu.vector_store %arg15[%c8_65, %c24_66], %193 {strides = array<i32>} : memref<16x32xbf16, #tpu.memory_space<vmem>>, vector<8x8xbf16>,
    %c0_67 = arith.constant 0 : index
    %c0_68 = arith.constant 0 : index
    %195 = vector.load %arg15[%c0_67, %c0_68] : memref<16x32xbf16, #tpu.memory_space<vmem>>, vector<16x32xbf16>
    %c0_69 = arith.constant 0 : index
    %c0_70 = arith.constant 0 : index
    %196 = vector.load %arg6[%c0_69, %c0_70] : memref<32x32xbf16, #tpu.memory_space<vmem>>, vector<32x32xbf16>
    %cst_71 = arith.constant dense<0.000000e+00> : vector<16x32xf32>
    %197 = tpu.matmul %195, %196, %cst_71 {dimension_numbers = #tpu.dot_dimension_numbers<[1], [0], [0], [1], [0, 0, 1, 1], [], []>} : vector<16x32xbf16>, vector<32x32xbf16>, vector<16x32xf32> -> vector<16x32xf32>
    %c0_72 = arith.constant 0 : index
    %c0_73 = arith.constant 0 : index
    %198 = vector.load %arg7[%c0_72, %c0_73] : memref<1x32xf32, #tpu.memory_space<vmem>>, vector<1x32xf32>
    %199 = vector.broadcast %198 : vector<1x32xf32> to vector<16x32xf32>
    %200 = arith.addf %197, %199 : vector<16x32xf32>
    %201 = arith.addf %0, %200 : vector<16x32xf32>
    %cst_74 = arith.constant dense<0.000000e+00> : vector<16xf32>
    %202 = vector.multi_reduction <add>, %201, %cst_74 [1] : vector<16x32xf32> to vector<16xf32>
    %203 = vector.shape_cast %202 : vector<16xf32> to vector<16x1xf32>
    %cst_75 = arith.constant 3.200000e+01 : f32
    %204 = vector.broadcast %cst_75 : f32 to vector<16x1xf32>
    %205 = arith.divf %203, %204 : vector<16x1xf32>
    %206 = vector.broadcast %205 : vector<16x1xf32> to vector<16x32xf32>
    %207 = arith.subf %201, %206 : vector<16x32xf32>
    %208 = arith.mulf %207, %207 : vector<16x32xf32>
    %cst_76 = arith.constant dense<0.000000e+00> : vector<16xf32>
    %209 = vector.multi_reduction <add>, %208, %cst_76 [1] : vector<16x32xf32> to vector<16xf32>
    %210 = vector.shape_cast %209 : vector<16xf32> to vector<16x1xf32>
    %cst_77 = arith.constant 3.200000e+01 : f32
    %211 = vector.broadcast %cst_77 : f32 to vector<16x1xf32>
    %212 = arith.divf %210, %211 : vector<16x1xf32>
    %213 = vector.broadcast %205 : vector<16x1xf32> to vector<16x32xf32>
    %214 = arith.subf %201, %213 : vector<16x32xf32>
    %cst_78 = arith.constant 9.99999974E-6 : f32
    %215 = vector.broadcast %cst_78 : f32 to vector<16x1xf32>
    %216 = arith.addf %212, %215 : vector<16x1xf32>
    %217 = math.rsqrt %216 : vector<16x1xf32>
    %218 = vector.broadcast %217 : vector<16x1xf32> to vector<16x32xf32>
    %219 = arith.mulf %214, %218 : vector<16x32xf32>
    %c0_79 = arith.constant 0 : index
    %c0_80 = arith.constant 0 : index
    %220 = vector.load %arg8[%c0_79, %c0_80] : memref<1x32xf32, #tpu.memory_space<vmem>>, vector<1x32xf32>
    %221 = vector.broadcast %220 : vector<1x32xf32> to vector<16x32xf32>
    %222 = arith.mulf %219, %221 : vector<16x32xf32>
    %c0_81 = arith.constant 0 : index
    %c0_82 = arith.constant 0 : index
    %223 = vector.load %arg9[%c0_81, %c0_82] : memref<1x32xf32, #tpu.memory_space<vmem>>, vector<1x32xf32>
    %224 = vector.broadcast %223 : vector<1x32xf32> to vector<16x32xf32>
    %225 = arith.addf %222, %224 : vector<16x32xf32>
    %226 = arith.truncf %225 : vector<16x32xf32> to vector<16x32xbf16>
    %c0_83 = arith.constant 0 : index
    %c0_84 = arith.constant 0 : index
    %227 = vector.load %arg10[%c0_83, %c0_84] : memref<32x64xbf16, #tpu.memory_space<vmem>>, vector<32x64xbf16>
    %cst_85 = arith.constant dense<0.000000e+00> : vector<16x64xf32>
    %228 = tpu.matmul %226, %227, %cst_85 {dimension_numbers = #tpu.dot_dimension_numbers<[1], [0], [0], [1], [0, 0, 1, 1], [], []>} : vector<16x32xbf16>, vector<32x64xbf16>, vector<16x64xf32> -> vector<16x64xf32>
    %c0_86 = arith.constant 0 : index
    %c0_87 = arith.constant 0 : index
    %229 = vector.load %arg11[%c0_86, %c0_87] : memref<1x64xf32, #tpu.memory_space<vmem>>, vector<1x64xf32>
    %230 = vector.broadcast %229 : vector<1x64xf32> to vector<16x64xf32>
    %231 = arith.addf %228, %230 : vector<16x64xf32>
    %cst_88 = arith.constant 5.000000e-01 : f32
    %232 = vector.broadcast %cst_88 : f32 to vector<16x64xf32>
    %233 = arith.mulf %231, %232 : vector<16x64xf32>
    %cst_89 = arith.constant 0.707106769 : f32
    %234 = vector.broadcast %cst_89 : f32 to vector<16x64xf32>
    %235 = arith.mulf %231, %234 : vector<16x64xf32>
    %236 = math.erf %235 : vector<16x64xf32>
    %cst_90 = arith.constant 1.000000e+00 : f32
    %237 = vector.broadcast %cst_90 : f32 to vector<16x64xf32>
    %238 = arith.addf %237, %236 : vector<16x64xf32>
    %239 = arith.mulf %233, %238 : vector<16x64xf32>
    %240 = arith.truncf %239 : vector<16x64xf32> to vector<16x64xbf16>
    %c0_91 = arith.constant 0 : index
    %c0_92 = arith.constant 0 : index
    %241 = vector.load %arg12[%c0_91, %c0_92] : memref<64x32xbf16, #tpu.memory_space<vmem>>, vector<64x32xbf16>
    %cst_93 = arith.constant dense<0.000000e+00> : vector<16x32xf32>
    %242 = tpu.matmul %240, %241, %cst_93 {dimension_numbers = #tpu.dot_dimension_numbers<[1], [0], [0], [1], [0, 0, 1, 1], [], []>} : vector<16x64xbf16>, vector<64x32xbf16>, vector<16x32xf32> -> vector<16x32xf32>
    %c0_94 = arith.constant 0 : index
    %c0_95 = arith.constant 0 : index
    %243 = vector.load %arg13[%c0_94, %c0_95] : memref<1x32xf32, #tpu.memory_space<vmem>>, vector<1x32xf32>
    %244 = vector.broadcast %243 : vector<1x32xf32> to vector<16x32xf32>
    %245 = arith.addf %242, %244 : vector<16x32xf32>
    %246 = arith.addf %201, %245 : vector<16x32xf32>
    %c0_96 = arith.constant 0 : index
    %c0_97 = arith.constant 0 : index
    %247 = vector.load %arg14[%c0_96, %c0_97] : memref<16x32xf32, #tpu.memory_space<vmem>>, vector<16x32xf32>
    tpu.vector_store %arg14[%c0_96, %c0_97], %246 {strides = array<i32>} : memref<16x32xf32, #tpu.memory_space<vmem>>, vector<16x32xf32>,
    return
  }
  func.func @transform_0(%arg0: i32) -> (i32, i32) {
    %c0_i32 = arith.constant 0 : i32
    %c0_i32_0 = arith.constant 0 : i32
    return %arg0, %c0_i32 : i32, i32
  }
  func.func @transform_1(%arg0: i32) -> (i32, i32) {
    %c0_i32 = arith.constant 0 : i32
    %c0_i32_0 = arith.constant 0 : i32
    %c0_i32_1 = arith.constant 0 : i32
    return %c0_i32, %c0_i32_0 : i32, i32
  }
  func.func @transform_2(%arg0: i32) -> (i32, i32) {
    %c0_i32 = arith.constant 0 : i32
    %c0_i32_0 = arith.constant 0 : i32
    %c0_i32_1 = arith.constant 0 : i32
    return %c0_i32, %c0_i32_0 : i32, i32
  }
  func.func @transform_3(%arg0: i32) -> (i32, i32) {
    %c0_i32 = arith.constant 0 : i32
    %c0_i32_0 = arith.constant 0 : i32
    %c0_i32_1 = arith.constant 0 : i32
    return %c0_i32, %c0_i32_0 : i32, i32
  }
  func.func @transform_4(%arg0: i32) -> (i32, i32) {
    %c0_i32 = arith.constant 0 : i32
    %c0_i32_0 = arith.constant 0 : i32
    %c0_i32_1 = arith.constant 0 : i32
    return %c0_i32, %c0_i32_0 : i32, i32
  }
  func.func @transform_5(%arg0: i32) -> (i32, i32) {
    %c0_i32 = arith.constant 0 : i32
    %c0_i32_0 = arith.constant 0 : i32
    %c0_i32_1 = arith.constant 0 : i32
    return %c0_i32, %c0_i32_0 : i32, i32
  }
  func.func @transform_6(%arg0: i32) -> (i32, i32) {
    %c0_i32 = arith.constant 0 : i32
    %c0_i32_0 = arith.constant 0 : i32
    %c0_i32_1 = arith.constant 0 : i32
    return %c0_i32, %c0_i32_0 : i32, i32
  }
  func.func @transform_7(%arg0: i32) -> (i32, i32) {
    %c0_i32 = arith.constant 0 : i32
    %c0_i32_0 = arith.constant 0 : i32
    %c0_i32_1 = arith.constant 0 : i32
    return %c0_i32, %c0_i32_0 : i32, i32
  }
  func.func @transform_8(%arg0: i32) -> (i32, i32) {
    %c0_i32 = arith.constant 0 : i32
    %c0_i32_0 = arith.constant 0 : i32
    %c0_i32_1 = arith.constant 0 : i32
    return %c0_i32, %c0_i32_0 : i32, i32
  }
  func.func @transform_9(%arg0: i32) -> (i32, i32) {
    %c0_i32 = arith.constant 0 : i32
    %c0_i32_0 = arith.constant 0 : i32
    %c0_i32_1 = arith.constant 0 : i32
    return %c0_i32, %c0_i32_0 : i32, i32
  }
  func.func @transform_10(%arg0: i32) -> (i32, i32) {
    %c0_i32 = arith.constant 0 : i32
    %c0_i32_0 = arith.constant 0 : i32
    %c0_i32_1 = arith.constant 0 : i32
    return %c0_i32, %c0_i32_0 : i32, i32
  }
  func.func @transform_11(%arg0: i32) -> (i32, i32) {
    %c0_i32 = arith.constant 0 : i32
    %c0_i32_0 = arith.constant 0 : i32
    %c0_i32_1 = arith.constant 0 : i32
    return %c0_i32, %c0_i32_0 : i32, i32
  }
  func.func @transform_12(%arg0: i32) -> (i32, i32) {
    %c0_i32 = arith.constant 0 : i32
    %c0_i32_0 = arith.constant 0 : i32
    %c0_i32_1 = arith.constant 0 : i32
    return %c0_i32, %c0_i32_0 : i32, i32
  }
  func.func @transform_13(%arg0: i32) -> (i32, i32) {
    %c0_i32 = arith.constant 0 : i32
    %c0_i32_0 = arith.constant 0 : i32
    return %arg0, %c0_i32 : i32, i32
  }
}

</mosaic_0001>

<bundles_post_ra>
// kernel: _transformer_block_impl.1
= control target key start
LH: loop header
LB: loop body
LE: loop exit
PB: predicated region body
PF: predicated region fallthrough
CT: control target
= control target key end

     0   :  { %18 = vsyncpa [#allocation4], 0  ;;  %s2411_s0 = inlined_call_operand.vmem [shape: f32[16,32], index: 0, kind: input, shape index: {}]   ;;  %s2412_s1 = inlined_call_operand.vmem [shape: f32[1,32], index: 1, kind: input, shape index: {}]   ;;  %s2413_s2 = inlined_call_operand.vmem [shape: f32[1,32], index: 2, kind: input, shape index: {}]   ;;  %s2414_s3 = inlined_call_operand.vmem [shape: bf16[32,96], index: 3, kind: input, shape index: {}]   ;;  %s2415_s4 = inlined_call_operand.hbm [shape: f32[1,96], index: 4, kind: input, shape index: {}]   ;;  %s2416_s5 = inlined_call_operand.vmem [shape: bf16[32,32], index: 5, kind: input, shape index: {}]   ;;  %s2417_s6 = inlined_call_operand.hbm [shape: f32[1,32], index: 6, kind: input, shape index: {}]   ;;  %s2418_s7 = inlined_call_operand.hbm [shape: f32[1,32], index: 7, kind: input, shape index: {}]   ;;  %s2419_s8 = inlined_call_operand.hbm [shape: f32[1,32], index: 8, kind: input, shape index: {}]   ;;  %s2420_s9 = inlined_call_operand.vmem [shape: bf16[32,64], index: 9, kind: input, shape index: {}]   ;;  %s2421_s10 = inlined_call_operand.hbm [shape: f32[1,64], index: 10, kind: input, shape index: {}]   ;;  %s2422_s11 = inlined_call_operand.vmem [shape: bf16[64,32], index: 11, kind: input, shape index: {}]   ;;  %s2423_s12 = inlined_call_operand.hbm [shape: f32[1,32], index: 12, kind: input, shape index: {}]   ;;  %s2424_s13 = inlined_call_operand.hbm [shape: f32[16,32], index: 13, kind: output, shape index: {}]  }
   0x1   :  { %19 = vsyncpa [#allocation7], 0 }
   0x2   :  { %20 = vsyncpa [#allocation10], 0 }
   0x3   :  { %21 = vsyncpa [#allocation13], 0 }
   0x4   :  { %22 = vsyncpa [#allocation5], 0  ;;  %s1939_s25 = smov [#allocation6]   ;;  %s1940_s27 = smov [#allocation9]  }
   0x5   :  { %s49_s26 = sshll.u32 %s1939_s25, 4  ;;  %s69_s28 = sshll.u32 %s1940_s27, 4  ;;  %s50_s26 = int_to_ptr.vmem [resolvable:$true] %s49_s26  ;;  %s70_s28 = int_to_ptr.vmem [resolvable:$true] %s69_s28 }
   0x6   :  { %s1775_s14 = scalar_lea.hbm %s2417_s6, 16 }
   0x7   :  { %p1776_p0 = scmp.ne.s32.totalorder %s2417_s6, %s1775_s14  ;;  %p1779_p1 = scmp.lt.u32.totalorder %s1775_s14, %s2417_s6 }
   0x9   :  { %p1781_p2 = pnand %p1779_p1, %p1776_p0 }
   0xb   :  { %1784 = shalt.err (!%p1781_p2)
}
   0xc   :  { %s1785_s19 = scalar_lea.vmem %s50_s26, 16  ;;  %s1789_s20 = scalar_lea.vmem %s50_s26, 32 }
   0xd   :  { %p1786_p3 = scmp.ne.s32.totalorder %s50_s26, %s1785_s19  ;;  %p1790_p4 = scmp.lt.s32.totalorder %s50_s26, %s50_s26 }
   0xe   :  { %p1791_p5 = scmp.lt.s32.totalorder %s1789_s20, %s1785_s19 }
  0x10   :  { %p1792_p6 = por %p1791_p5, %p1790_p4 }
  0x12   :  { %p1793_p7 = pnand %p1792_p6, %p1786_p3 }
  0x14   :  { %1796 = shalt.err (!%p1793_p7)
}
  0x15   :  { %52 = dma.hbm_to_vmem [thread:$0]  %s2417_s6, 16, %s50_s26, [#allocation7]  }
  0x16   :  { %s1797_s25 = scalar_lea.hbm %s2419_s8, 16 }
  0x17   :  { %p1798_p8 = scmp.ne.s32.totalorder %s2419_s8, %s1797_s25  ;;  %p1801_p9 = scmp.lt.u32.totalorder %s1797_s25, %s2419_s8 }
  0x19   :  { %p1803_p10 = pnand %p1801_p9, %p1798_p8 }
  0x1b   :  { %1806 = shalt.err (!%p1803_p10)
}
  0x1c   :  { %s1807_s15 = scalar_lea.vmem %s70_s28, 16  ;;  %s1811_s16 = scalar_lea.vmem %s70_s28, 32 }
  0x1d   :  { %p1808_p11 = scmp.ne.s32.totalorder %s70_s28, %s1807_s15  ;;  %p1812_p12 = scmp.lt.s32.totalorder %s70_s28, %s70_s28 }
  0x1e   :  { %p1813_p13 = scmp.lt.s32.totalorder %s1811_s16, %s1807_s15 }
  0x20   :  { %p1814_p0 = por %p1813_p13, %p1812_p12 }
  0x22   :  { %p1815_p1 = pnand %p1814_p0, %p1808_p11 }
  0x24   :  { %1818 = shalt.err (!%p1815_p1)
}
  0x25   :  { %72 = dma.hbm_to_vmem [thread:$0]  %s2419_s8, 16, %s70_s28, [#allocation10]  }
  0x26   :  { %s1941_s17 = smov [#allocation3]   ;;  %s1942_s19 = smov [#allocation8]  }
  0x27   :  { %s37_s18 = sshll.u32 %s1941_s17, 4  ;;  %s59_s20 = sshll.u32 %s1942_s19, 4  ;;  %s38_s18 = int_to_ptr.vmem [resolvable:$true] %s37_s18  ;;  %s60_s20 = int_to_ptr.vmem [resolvable:$true] %s59_s20 }
  0x28   :  { %s1819_s23 = scalar_lea.hbm %s2415_s4, 16 }
  0x29   :  { %p1820_p2 = scmp.ne.s32.totalorder %s2415_s4, %s1819_s23  ;;  %p1823_p3 = scmp.lt.u32.totalorder %s1819_s23, %s2415_s4 }
  0x2b   :  { %p1825_p4 = pnand %p1823_p3, %p1820_p2 }
  0x2d   :  { %1828 = shalt.err (!%p1825_p4)
}
  0x2e   :  { %s1829_s8 = scalar_lea.vmem %s38_s18, 16  ;;  %s1833_s28 = scalar_lea.vmem %s38_s18, 32 }
  0x2f   :  { %p1830_p5 = scmp.ne.s32.totalorder %s38_s18, %s1829_s8  ;;  %p1834_p6 = scmp.lt.s32.totalorder %s38_s18, %s38_s18 }
  0x30   :  { %p1835_p7 = scmp.lt.s32.totalorder %s1833_s28, %s1829_s8 }
  0x32   :  { %p1836_p8 = por %p1835_p7, %p1834_p6 }
  0x34   :  { %p1837_p9 = pnand %p1836_p8, %p1830_p5 }
  0x36   :  { %1840 = shalt.err (!%p1837_p9)
}
  0x37   :  { %40 = dma.hbm_to_vmem [thread:$0]  %s2415_s4, 16, %s38_s18, [#allocation4]  }
  0x38   :  { %s1841_s6 = scalar_lea.hbm %s2418_s7, 16 }
  0x39   :  { %p1842_p10 = scmp.ne.s32.totalorder %s2418_s7, %s1841_s6  ;;  %p1845_p11 = scmp.lt.u32.totalorder %s1841_s6, %s2418_s7 }
  0x3b   :  { %p1847_p12 = pnand %p1845_p11, %p1842_p10 }
  0x3d   :  { %1850 = shalt.err (!%p1847_p12)
}
  0x3e   :  { %s1851_s22 = scalar_lea.vmem %s60_s20, 16  ;;  %s1855_s23 = scalar_lea.vmem %s60_s20, 32 }
  0x3f   :  { %p1852_p13 = scmp.ne.s32.totalorder %s60_s20, %s1851_s22  ;;  %p1856_p0 = scmp.lt.s32.totalorder %s60_s20, %s60_s20 }
  0x40   :  { %p1857_p1 = scmp.lt.s32.totalorder %s1855_s23, %s1851_s22 }
  0x42   :  { %p1858_p2 = por %p1857_p1, %p1856_p0 }
  0x44   :  { %p1859_p3 = pnand %p1858_p2, %p1852_p13 }
  0x46   :  { %1862 = shalt.err (!%p1859_p3)
}
  0x47   :  { %62 = dma.hbm_to_vmem [thread:$0]  %s2418_s7, 16, %s60_s20, [#allocation7]  }
  0x48   :  { %s1943_s24 = smov [#allocation11]   ;;  %s1944_s27 = smov [#allocation12]  }
  0x49   :  { %s81_s25 = sshll.u32 %s1943_s24, 4  ;;  %s93_s29 = sshll.u32 %s1944_s27, 4  ;;  %s82_s25 = int_to_ptr.vmem [resolvable:$true] %s81_s25  ;;  %s94_s29 = int_to_ptr.vmem [resolvable:$true] %s93_s29 }
  0x4a   :  { %s1863_s30 = scalar_lea.hbm %s2421_s10, 16 }
  0x4b   :  { %p1864_p4 = scmp.ne.s32.totalorder %s2421_s10, %s1863_s30  ;;  %p1867_p5 = scmp.lt.u32.totalorder %s1863_s30, %s2421_s10 }
  0x4d   :  { %p1869_p6 = pnand %p1867_p5, %p1864_p4 }
  0x4f   :  { %1872 = shalt.err (!%p1869_p6)
}
  0x50   :  { %s1873_s7 = scalar_lea.vmem %s82_s25, 16  ;;  %s1877_s20 = scalar_lea.vmem %s82_s25, 32 }
  0x51   :  { %p1874_p7 = scmp.ne.s32.totalorder %s82_s25, %s1873_s7  ;;  %p1878_p8 = scmp.lt.s32.totalorder %s82_s25, %s82_s25 }
  0x52   :  { %p1879_p9 = scmp.lt.s32.totalorder %s1877_s20, %s1873_s7 }
  0x54   :  { %p1880_p10 = por %p1879_p9, %p1878_p8 }
  0x56   :  { %p1881_p11 = pnand %p1880_p10, %p1874_p7 }
  0x58   :  { %1884 = shalt.err (!%p1881_p11)
}
  0x59   :  { %84 = dma.hbm_to_vmem [thread:$0]  %s2421_s10, 16, %s82_s25, [#allocation10]  }
  0x5a   :  { %s1885_s22 = scalar_lea.hbm %s2423_s12, 16 }
  0x5b   :  { %p1886_p12 = scmp.ne.s32.totalorder %s2423_s12, %s1885_s22  ;;  %p1889_p13 = scmp.lt.u32.totalorder %s1885_s22, %s2423_s12 }
  0x5d   :  { %p1891_p0 = pnand %p1889_p13, %p1886_p12 }
  0x5f   :  { %1894 = shalt.err (!%p1891_p0)
}
  0x60   :  { %s1895_s27 = scalar_lea.vmem %s94_s29, 16  ;;  %s1899_s8 = scalar_lea.vmem %s94_s29, 32 }
  0x61   :  { %p1896_p1 = scmp.ne.s32.totalorder %s94_s29, %s1895_s27  ;;  %p1900_p2 = scmp.lt.s32.totalorder %s94_s29, %s94_s29 }
  0x62   :  { %p1901_p3 = scmp.lt.s32.totalorder %s1899_s8, %s1895_s27 }
  0x64   :  { %p1902_p4 = por %p1901_p3, %p1900_p2 }
  0x66   :  { %p1903_p5 = pnand %p1902_p4, %p1896_p1 }
  0x68   :  { %1906 = shalt.err (!%p1903_p5)
}
  0x69   :  { %96 = dma.hbm_to_vmem [thread:$0]  %s2423_s12, 16, %s94_s29, [#allocation13]  }
  0x6a   :  { %1929 = dma.done.wait [#allocation4], 16  }
  0x6b   :  { %1930 = vsyncadd [#allocation4], 4294967280 }
  0x6c   :  { %1931 = dma.done.wait [#allocation7], 32  }
  0x6d   :  { %1932 = vsyncadd [#allocation7], 4294967264 }
  0x6e   :  { %1933 = dma.done.wait [#allocation10], 32  }
  0x6f   :  { %1934 = vsyncadd [#allocation10], 4294967264 }
  0x70   :  { %1935 = dma.done.wait [#allocation13], 16  }
  0x71   :  { %1936 = vsyncadd [#allocation13], 4294967280  ;;  %vm118_vm0 = vcmask 261120   ;;  %v2108_v0 = vld [vmem:[%s2411_s0] sm:$0xff]  ;;  %v2113_v1 = vld [vmem:[%s2411_s0 + $0x8] sm:$0xff]  ;;  %v1945_v15 = vmov 0.0  }
  0x72   :  { %v119_v2 = vsel %vm118_vm0, %v2108_v0, 0.0  ;;  %v122_v3 = vsel %vm118_vm0, %v2113_v1, 0.0  ;;  %v1721_v14 = vld [vmem:[%s2414_s3] sm:$0xff]   ;;  %1565 = vmatprep.subr.bf16.mxu0 %v1945_v15  ;;  %1573 = vmatprep.subr.bf16.mxu1 %v1945_v15  ;;  %v1722_v16 = vld [vmem:[%s2414_s3 + $0x8] sm:$0xff]   ;;  %vm1946_vm1 = vmmov 0   ;;  %s1949_s26 = smov 120  }
  0x73   :  { %120 = vadd.xlane.f32.xlu0 %v119_v2  ;;  %1566 = vmatpush3.bf16.msra.mxu0 %v1721_v14  ;;  %v1481_v25 = vld [vmem:[%s2412_s1] ss:$0 sm:$0xff]  ;;  %v1483_v34 = vld [vmem:[#allocation3] ss:$0 sm:$0xff]  ;;  %s1947_s1 = smov 88   ;;  %s1950_s17 = smov 112  }
  0x74   :  { %1569 = vmatprep.mubr.msk.bf16.mxu0 %vm1946_vm1, %v1945_v15  ;;  %1567 = vmatprep.subr.bf16.mxu0 %v1945_v15  ;;  %v1482_v29 = vld [vmem:[%s2413_s2] ss:$0 sm:$0xff]  ;;  %s1948_s2 = smov 96   ;;  %s1951_s19 = smov 80   ;;  %vm241_vm2 = vcmask 64512   ;;  %vm306_vm4 = vcmask 1043456  }
  0x75   :  { %1575 = vmatprep.mubr.msk.bf16.mxu1 %vm1946_vm1, %v1945_v15  ;;  %s1952_s21 = smov 104   ;;  %s1953_s22 = smov 72   ;;  %vm351_vm5 = vcmask 60416   ;;  %vm821_vm6 = vcmask 64516   ;;  %vm469_vm7 = vcmask 126016   ;;  %vm587_vm8 = vcmask 191616  }
  0x76   :  { %s1954_s23 = smov 56   ;;  %s1955_s4 = smov 64   ;;  %vm705_vm9 = vcmask 257216   ;;  %vm940_vm10 = vcmask 130116   ;;  %vm1059_vm11 = vcmask 195716   ;;  %vm1178_vm12 = vcmask 261316  }
  0x77   :  { %123 = vadd.xlane.f32.xlu0 %v122_v3  ;;  %1568 = vmatpush3.bf16.msra.mxu0 %v1722_v16  ;;  %v233_v3 = vlaneseq  ;;  %s1956_s18 = smov 48   ;;  %s1957_s24 = smov 40   ;;  %vm1412_vm13 = vcmask 523264  }
  0x78   :  { %1579 = vmatprep.subr.bf16.mxu0 %v1945_v15  ;;  %s1958_s27 = smov 8   ;;  %s1959_s8 = smov 16  }
  0x79   :  { %s1960_s10 = smov 24  }
 0x100   :  { %v121_v4 = vpop.xlane.xlu0 %120 }
 0x101   :  { %v126_v5 = vmul.f32 0.03125, %v121_v4  ;;  %v234_v4 = vshrl.u32 %v233_v3, 7 }
 0x103   :  { %v128_v6 = vsub.f32 %v2108_v0, %v126_v5  ;;  %v236_v5 = vand.u32 127, %v233_v3 }
 0x104   :  { %v124_v7 = vpop.xlane.xlu0 %123 }
 0x105   :  { %v127_v8 = vmul.f32 0.03125, %v124_v7  ;;  %v130_v9 = vmul.f32 %v128_v6, %v128_v6  ;;  %vm2209_vm3 = vcmp.ge.s32.totalorder %v234_v4, %v236_v5 }
 0x107   :  { %v129_v10 = vsub.f32 %v2113_v1, %v127_v8  ;;  %v132_v11 = vsel %vm118_vm0, %v130_v9, 0.0 }
 0x108   :  { %133 = vadd.xlane.f32.xlu1 %v132_v11 }
 0x109   :  { %v131_v12 = vmul.f32 %v129_v10, %v129_v10 }
 0x10b   :  { %v135_v13 = vsel %vm118_vm0, %v131_v12, 0.0 }
 0x10c   :  { %136 = vadd.xlane.f32.xlu1 %v135_v13 }
 0x195   :  { %v134_v17 = vpop.xlane.xlu1 %133 }
 0x196   :  { %v138_v18 = vmul.f32 0.03125, %v134_v17 }
 0x198   :  { %v140_v19 = vadd.f32 1e-05, %v138_v18 }
 0x199   :  { %v137_v20 = vpop.xlane.xlu1 %136 }
 0x19a   :  { %1731 = vrsqrt.f32 %v140_v19  ;;  %v139_v21 = vmul.f32 0.03125, %v137_v20 }
 0x19c   :  { %v141_v22 = vadd.f32 1e-05, %v139_v21 }
 0x19e   :  { %1733 = vrsqrt.f32 %v141_v22 }
 0x1a4   :  { %v1732_v23 = vpop.eup %1731 }
 0x1a5   :  { %v144_v24 = vmul.f32 %v1732_v23, %v128_v6 }
 0x1a7   :  { %v153_v28 = vmul.f32 %v1481_v25, %v144_v24 }
 0x1a8   :  { %v1734_v26 = vpop.eup %1733 }
 0x1a9   :  { %v145_v27 = vmul.f32 %v1734_v26, %v129_v10  ;;  %v162_v31 = vadd.f32 %v1482_v29, %v153_v28 }
 0x1ab   :  { %v154_v30 = vmul.f32 %v1481_v25, %v145_v27 }
 0x1ad   :  { %v163_v32 = vadd.f32 %v1482_v29, %v154_v30 }
 0x1af   :  { %v164_v33 = vpack.c.bf16 %v163_v32, %v162_v31 }
 0x1b1   :  { %1570 = vmatmul.mubr.msk.bf16.vlgmr.msra.gmra.mrb[0].mxu0 %vm118_vm0, %v164_v33 }
 0x1b2   :  { %1581 = vmatprep.mubr.msk.bf16.mxu0 %vm1946_vm1, %v1945_v15 }
 0x284   :  { %v225_v35 = vpop.f32.mrb[0].mxu0 }
 0x285   :  { %v1571_v36 = vpop.f32.mrb[1].mxu0  ;;  %v226_v38 = vadd.f32 %v1483_v34, %v225_v35 }
 0x286   :  { %v228_v37 = vpop.f32.mrb[2].mxu0 }
 0x287   :  { %v229_v39 = vadd.f32 %v1483_v34, %v228_v37  ;;  %v1572_v40 = vpop.f32.mrb[3].mxu0 }
 0x289   :  { %v2146_v41 = vpack.c.bf16 %v229_v39, %v226_v38 }
 0x28b   :  { %355 = vrot.lane.b32.xlu1 %v2146_v41, %s1947_s1  ;;  %239 = vrot.lane.b32.xlu0 %v2146_v41, %s1948_s2  ;;  %v2155_v42 = vrot.slane %v2146_v41, 4 }
 0x28f   :  { %353 = vrot.lane.b32.xlu1 %v2146_v41, %s1949_s26  ;;  %471 = vrot.lane.b32.xlu0 %v2146_v41, %s1950_s17 }
 0x293   :  { %473 = vrot.lane.b32.xlu1 %v2146_v41, %s1951_s19  ;;  %589 = vrot.lane.b32.xlu0 %v2146_v41, %s1952_s21 }
 0x297   :  { %591 = vrot.lane.b32.xlu1 %v2146_v41, %s1953_s22  ;;  %825 = vrot.lane.b32.xlu0 %v2155_v42, %s1947_s1 }
 0x29b   :  { %944 = vrot.lane.b32.xlu0 %v2155_v42, %s1951_s19  ;;  %708 = vrot.lane.b32.xlu1 %v2155_v42, %s1948_s2 }
 0x29f   :  { %1063 = vrot.lane.b32.xlu0 %v2155_v42, %s1953_s22  ;;  %823 = vrot.lane.b32.xlu1 %v2155_v42, %s1949_s26 }
 0x2a3   :  { %942 = vrot.lane.b32.xlu1 %v2155_v42, %s1950_s17 }
 0x2a7   :  { %1061 = vrot.lane.b32.xlu1 %v2155_v42, %s1952_s21 }
 0x2ab   :  { %416 = vrot.lane.b32.xlu1 %v2146_v41, %s1954_s23 }
 0x2fd   :  { %v240_v43 = vpop.permute.xlu0 %239  ;;  %v356_v45 = vpop.permute.xlu1 %355 }
 0x2fe   :  { %v246_v44 = vsel %vm241_vm2, %v240_v43, 0  ;;  %v361_v47 = vsel %vm241_vm2, %v356_v45, 0 }
 0x2ff   :  { %1574 = vmatpush3.bf16.xpose.msra.mxu1 %v246_v44 }
 0x300   :  { %1585 = vmatprep.subr.bf16.mxu1 %v1945_v15 }
 0x301   :  { %v354_v46 = vpop.permute.xlu1 %353  ;;  %v472_v51 = vpop.permute.xlu0 %471 }
 0x305   :  { %v474_v48 = vpop.permute.xlu1 %473  ;;  %v590_v54 = vpop.permute.xlu0 %589 }
 0x306   :  { %1576 = vmatmul.mubr.msk.bf16.vlgmr.msra.gmra.mrb[0].mxu1 %vm241_vm2, %v2146_v41  ;;  %v479_v49 = vsel %vm241_vm2, %v474_v48, 0 }
 0x307   :  { %1586 = vmatpush3.bf16.xpose.msra.mxu1 %v361_v47  ;;  %1587 = vmatprep.mubr.msk.bf16.mxu1 %vm1946_vm1, %v1945_v15 }
 0x308   :  { %1597 = vmatprep.subr.bf16.mxu1 %v1945_v15 }
 0x309   :  { %v592_v50 = vpop.permute.xlu1 %591  ;;  %v826_v56 = vpop.permute.xlu0 %825 }
 0x30a   :  { %v597_v52 = vsel %vm241_vm2, %v592_v50, 0  ;;  %v831_v57 = vsel %vm241_vm2, %v826_v56, 0 }
 0x30d   :  { %v709_v53 = vpop.permute.xlu1 %708  ;;  %v945_v58 = vpop.permute.xlu0 %944 }
 0x30e   :  { %1588 = vmatmul.mubr.msk.bf16.vlgmr.msra.gmra.mrb[4].mxu1 %vm241_vm2, %v354_v46  ;;  %v714_v55 = vsel %vm241_vm2, %v709_v53, 0  ;;  %v950_v60 = vsel %vm241_vm2, %v945_v58, 0 }
 0x30f   :  { %1598 = vmatpush3.bf16.xpose.msra.mxu1 %v479_v49  ;;  %1599 = vmatprep.mubr.msk.bf16.mxu1 %vm1946_vm1, %v1945_v15 }
 0x310   :  { %1609 = vmatprep.subr.bf16.mxu1 %v1945_v15 }
 0x311   :  { %v824_v59 = vpop.permute.xlu1 %823  ;;  %v1064_v61 = vpop.permute.xlu0 %1063 }
 0x312   :  { %v1069_v63 = vsel %vm241_vm2, %v1064_v61, 0 }
 0x315   :  { %v943_v62 = vpop.permute.xlu1 %942 }
 0x316   :  { %1600 = vmatmul.mubr.msk.bf16.vlgmr.msra.gmra.mrb[8].mxu1 %vm241_vm2, %v472_v51 }
 0x317   :  { %1610 = vmatpush3.bf16.xpose.msra.mxu1 %v597_v52  ;;  %1611 = vmatprep.mubr.msk.bf16.mxu1 %vm1946_vm1, %v1945_v15 }
 0x318   :  { %1621 = vmatprep.subr.bf16.mxu1 %v1945_v15 }
 0x319   :  { %v1062_v2 = vpop.permute.xlu1 %1061 }
 0x31d   :  { %v2253_v61 = vpop.permute.xlu1 %416 }
 0x31e   :  { %1612 = vmatmul.mubr.msk.bf16.vlgmr.msra.gmra.mrb[12].mxu1 %vm241_vm2, %v590_v54 }
 0x31f   :  { %1622 = vmatpush3.bf16.xpose.msra.mxu1 %v714_v55  ;;  %1623 = vmatprep.mubr.msk.bf16.mxu1 %vm1946_vm1, %v1945_v15 }
 0x320   :  { %1633 = vmatprep.subr.bf16.mxu1 %v1945_v15 }
 0x326   :  { %1624 = vmatmul.mubr.msk.bf16.vlgmr.msra.gmra.mrb[16].mxu1 %vm241_vm2, %v2155_v42 }
 0x327   :  { %1634 = vmatpush3.bf16.xpose.msra.mxu1 %v831_v57  ;;  %1635 = vmatprep.mubr.msk.bf16.mxu1 %vm1946_vm1, %v1945_v15 }
 0x328   :  { %1645 = vmatprep.subr.bf16.mxu1 %v1945_v15 }
 0x32e   :  { %1636 = vmatmul.mubr.msk.bf16.vlgmr.msra.gmra.mrb[20].mxu1 %vm241_vm2, %v824_v59 }
 0x32f   :  { %1646 = vmatpush3.bf16.xpose.msra.mxu1 %v950_v60  ;;  %1647 = vmatprep.mubr.msk.bf16.mxu1 %vm1946_vm1, %v1945_v15 }
 0x330   :  { %1657 = vmatprep.subr.bf16.mxu1 %v1945_v15 }
 0x336   :  { %1648 = vmatmul.mubr.msk.bf16.vlgmr.msra.gmra.mrb[24].mxu1 %vm241_vm2, %v943_v62 }
 0x337   :  { %1658 = vmatpush3.bf16.xpose.msra.mxu1 %v1069_v63  ;;  %1659 = vmatprep.mubr.msk.bf16.mxu1 %vm1946_vm1, %v1945_v15 }
 0x338   :  { %1669 = vmatprep.subr.bf16.mxu1 %v1945_v15 }
 0x33e   :  { %1660 = vmatmul.mubr.msk.bf16.vlgmr.msra.gmra.mrb[28].mxu1 %vm241_vm2, %v1062_v2 }
 0x33f   :  { %1673 = vmatprep.mubr.msk.bf16.mxu1 %vm1946_vm1, %v1945_v15 }
 0x3d9   :  { %v282_v7 = vpop.f32.mrb[0].mxu1 }
 0x3da   :  { %v288_v8 = vsel %vm2209_vm3, %v282_v7, -1e+30  ;;  %v1577_v9 = vpop.f32.mrb[1].mxu1 }
 0x3db   :  { %v285_v10 = vpop.f32.mrb[2].mxu1  ;;  %v289_v11 = vsel %vm241_vm2, %v288_v8, -inf }
 0x3dc   :  { %v1578_v12 = vpop.f32.mrb[3].mxu1  ;;  %290 = vmax.xlane.f32.xlu0 %v289_v11 }
 0x3e1   :  { %v397_v13 = vpop.f32.mrb[4].mxu1 }
 0x3e2   :  { %v2218_v14 = vsel %vm2209_vm3, %v397_v13, -1e+30  ;;  %v1589_v16 = vpop.f32.mrb[5].mxu1 }
 0x3e3   :  { %v400_v17 = vpop.f32.mrb[6].mxu1  ;;  %v404_v18 = vsel %vm241_vm2, %v2218_v14, -inf }
 0x3e4   :  { %v1590_v19 = vpop.f32.mrb[7].mxu1  ;;  %405 = vmax.xlane.f32.xlu1 %v404_v18 }
 0x3e9   :  { %v515_v20 = vpop.f32.mrb[8].mxu1 }
 0x3ea   :  { %v1601_v21 = vpop.f32.mrb[9].mxu1  ;;  %v521_v45 = vsel %vm2209_vm3, %v515_v20, -1e+30 }
 0x3eb   :  { %v518_v22 = vpop.f32.mrb[10].mxu1  ;;  %v522_v46 = vsel %vm241_vm2, %v521_v45, -inf }
 0x3ec   :  { %v1602_v23 = vpop.f32.mrb[11].mxu1 }
 0x3f1   :  { %v633_v24 = vpop.f32.mrb[12].mxu1 }
 0x3f2   :  { %v1613_v25 = vpop.f32.mrb[13].mxu1  ;;  %301 = vrot.lane.b32.xlu0 %v2146_v41, %s1955_s4  ;;  %v639_v47 = vsel %vm2209_vm3, %v633_v24, -1e+30 }
 0x3f3   :  { %v636_v26 = vpop.f32.mrb[14].mxu1  ;;  %v640_v54 = vsel %vm241_vm2, %v639_v47, -inf }
 0x3f4   :  { %v1614_v27 = vpop.f32.mrb[15].mxu1 }
 0x3f9   :  { %v750_v28 = vpop.f32.mrb[16].mxu1 }
 0x3fa   :  { %v1625_v29 = vpop.f32.mrb[17].mxu1  ;;  %v756_v55 = vsel %vm2209_vm3, %v750_v28, -1e+30 }
 0x3fb   :  { %v753_v30 = vpop.f32.mrb[18].mxu1  ;;  %v757_v56 = vsel %vm241_vm2, %v756_v55, -inf }
 0x3fc   :  { %v1626_v31 = vpop.f32.mrb[19].mxu1 }
 0x401   :  { %v867_v32 = vpop.f32.mrb[20].mxu1 }
 0x402   :  { %v2226_v33 = vsel %vm2209_vm3, %v867_v32, -1e+30  ;;  %v1637_v34 = vpop.f32.mrb[21].mxu1 }
 0x403   :  { %v870_v35 = vpop.f32.mrb[22].mxu1  ;;  %v874_v36 = vsel %vm241_vm2, %v2226_v33, -inf }
 0x404   :  { %875 = vmax.xlane.f32.xlu1 %v874_v36  ;;  %v1638_v37 = vpop.f32.mrb[23].mxu1 }
 0x409   :  { %v986_v38 = vpop.f32.mrb[24].mxu1 }
 0x40a   :  { %v2232_v39 = vsel %vm2209_vm3, %v986_v38, -1e+30  ;;  %v1649_v40 = vpop.f32.mrb[25].mxu1 }
 0x40b   :  { %v989_v43 = vpop.f32.mrb[26].mxu1  ;;  %v993_v57 = vsel %vm241_vm2, %v2232_v39, -inf }
 0x40c   :  { %v1650_v44 = vpop.f32.mrb[27].mxu1 }
 0x411   :  { %523 = vmax.xlane.f32.xlu0 %v522_v46  ;;  %v1105_v48 = vpop.f32.mrb[28].mxu1 }
 0x412   :  { %v2241_v49 = vsel %vm2209_vm3, %v1105_v48, -1e+30  ;;  %v1661_v50 = vpop.f32.mrb[29].mxu1 }
 0x413   :  { %v1108_v51 = vpop.f32.mrb[30].mxu1  ;;  %v1112_v52 = vsel %vm241_vm2, %v2241_v49, -inf }
 0x414   :  { %1113 = vmax.xlane.f32.xlu1 %v1112_v52  ;;  %v1662_v53 = vpop.f32.mrb[31].mxu1 }
 0x415   :  { %641 = vmax.xlane.f32.xlu0 %v640_v54 }
 0x419   :  { %758 = vmax.xlane.f32.xlu0 %v757_v56 }
 0x41d   :  { %994 = vmax.xlane.f32.xlu0 %v993_v57 }
 0x433   :  { %534 = vrot.lane.b32.xlu0 %v2146_v41, %s1956_s18 }
 0x469   :  { %v291_v58 = vpop.xlane.xlu0 %290 }
 0x46a   :  { %v292_v59 = vsub.f32 %v288_v8, %v291_v58 }
 0x46c   :  { %v293_v60 = vmul.f32 1.442695, %v292_v59 }
 0x46d   :  { %v302_v62 = vpop.permute.xlu0 %301 }
 0x46e   :  { %1735 = vpow2.f32 %v293_v60  ;;  %v308_v63 = vsel %vm306_vm4, %v302_v62, 0 }
 0x46f   :  { %1580 = vmatpush3.bf16.msra.mxu0 %v308_v63 }
 0x470   :  { %1591 = vmatprep.subr.bf16.mxu0 %v1945_v15 }
 0x471   :  { %v406_v2 = vpop.xlane.xlu1 %405 }
 0x472   :  { %v407_v3 = vsub.f32 %v2218_v14, %v406_v2 }
 0x474   :  { %v408_v4 = vmul.f32 1.442695, %v407_v3 }
 0x476   :  { %1737 = vpow2.f32 %v408_v4 }
 0x478   :  { %v1736_v5 = vpop.eup %1735 }
 0x479   :  { %v295_v6 = vsel %vm241_vm2, %v1736_v5, 0.0 }
 0x47a   :  { %296 = vadd.xlane.f32.xlu0 %v295_v6 }
 0x480   :  { %v2259_v7 = vpop.eup %1737 }
 0x481   :  { %v410_v8 = vsel %vm241_vm2, %v2259_v7, 0.0 }
 0x482   :  { %411 = vadd.xlane.f32.xlu1 %v410_v8 }
 0x491   :  { %v876_v16 = vpop.xlane.xlu1 %875 }
 0x492   :  { %v877_v19 = vsub.f32 %v2226_v33, %v876_v16 }
 0x493   :  { %769 = vrot.lane.b32.xlu1 %v2155_v42, %s1955_s4 }
 0x494   :  { %v878_v22 = vmul.f32 1.442695, %v877_v19 }
 0x49e   :  { %v524_v9 = vpop.xlane.xlu0 %523 }
 0x49f   :  { %v525_v10 = vsub.f32 %v521_v45, %v524_v9 }
 0x4a1   :  { %v526_v11 = vmul.f32 1.442695, %v525_v10  ;;  %v1114_v33 = vpop.xlane.xlu1 %1113 }
 0x4a2   :  { %v642_v12 = vpop.xlane.xlu0 %641  ;;  %v1115_v34 = vsub.f32 %v2241_v49, %v1114_v33 }
 0x4a3   :  { %1739 = vpow2.f32 %v526_v11  ;;  %v643_v13 = vsub.f32 %v639_v47, %v642_v12  ;;  %v422_v47 = vsel %vm306_vm4, %v2253_v61, 0 }
 0x4a4   :  { %v1116_v36 = vmul.f32 1.442695, %v1115_v34 }
 0x4a5   :  { %v644_v14 = vmul.f32 1.442695, %v643_v13 }
 0x4a6   :  { %v759_v17 = vpop.xlane.xlu0 %758 }
 0x4a7   :  { %v760_v18 = vsub.f32 %v756_v55, %v759_v17  ;;  %1741 = vpow2.f32 %v644_v14 }
 0x4a9   :  { %v761_v20 = vmul.f32 1.442695, %v760_v18 }
 0x4aa   :  { %v995_v30 = vpop.xlane.xlu0 %994 }
 0x4ab   :  { %1743 = vpow2.f32 %v761_v20  ;;  %v996_v31 = vsub.f32 %v2232_v39, %v995_v30 }
 0x4ac   :  { %1745 = vpow2.f32 %v878_v22 }
 0x4ad   :  { %v1740_v21 = vpop.eup %1739  ;;  %v997_v32 = vmul.f32 1.442695, %v996_v31 }
 0x4ae   :  { %v528_v23 = vsel %vm241_vm2, %v1740_v21, 0.0  ;;  %v535_v39 = vpop.permute.xlu0 %534 }
 0x4af   :  { %529 = vadd.xlane.f32.xlu0 %v528_v23  ;;  %1747 = vpow2.f32 %v997_v32  ;;  %v540_v50 = vsel %vm306_vm4, %v535_v39, 0 }
 0x4b0   :  { %1749 = vpow2.f32 %v1116_v36 }
 0x4b1   :  { %v2267_v24 = vpop.eup %1741 }
 0x4b2   :  { %v646_v25 = vsel %vm241_vm2, %v2267_v24, 0.0 }
 0x4b5   :  { %v2271_v26 = vpop.eup %1743 }
 0x4b6   :  { %v763_v27 = vsel %vm241_vm2, %v2271_v26, 0.0  ;;  %v2275_v28 = vpop.eup %1745 }
 0x4b7   :  { %647 = vadd.xlane.f32.xlu1 %v646_v25  ;;  %v880_v29 = vsel %vm241_vm2, %v2275_v28, 0.0 }
 0x4b9   :  { %v2284_v35 = vpop.eup %1747 }
 0x4ba   :  { %v999_v37 = vsel %vm241_vm2, %v2284_v35, 0.0 }
 0x4bb   :  { %764 = vadd.xlane.f32.xlu1 %v763_v27 }
 0x4bf   :  { %881 = vadd.xlane.f32.xlu1 %v880_v29 }
 0x4c5   :  { %652 = vrot.lane.b32.xlu0 %v2146_v41, %s1957_s24  ;;  %v2288_v41 = vpop.eup %1749 }
 0x4c6   :  { %v1118_v38 = vsel %vm241_vm2, %v2288_v41, 0.0 }
 0x4d0   :  { %886 = vrot.lane.b32.xlu1 %v2155_v42, %s1954_s23 }
 0x4e4   :  { %1000 = vadd.xlane.f32.xlu0 %v999_v37 }
 0x4f4   :  { %1119 = vadd.xlane.f32.xlu1 %v1118_v38 }
 0x4fa   :  { %1005 = vrot.lane.b32.xlu0 %v2155_v42, %s1956_s18 }
 0x505   :  { %1124 = vrot.lane.b32.xlu1 %v2155_v42, %s1957_s24 }
 0x507   :  { %v297_v40 = vpop.xlane.xlu0 %296 }
 0x508   :  { %1751 = vrcp.f32 %v297_v40 }
 0x50f   :  { %v412_v43 = vpop.xlane.xlu1 %411 }
 0x510   :  { %1753 = vrcp.f32 %v412_v43 }
 0x512   :  { %v1752_v44 = vpop.eup %1751 }
 0x513   :  { %v299_v45 = vmul.f32 %v1752_v44, %v1736_v5  ;;  %v770_v52 = vpop.permute.xlu1 %769 }
 0x514   :  { %v775_v3 = vsel %vm306_vm4, %v770_v52, 0 }
 0x515   :  { %v300_v46 = vpack.c.bf16 %v299_v45, %v299_v45 }
 0x517   :  { %1582 = vmatmul.mubr.msk.bf16.vlgmr.msra.gmra.mrb[4].mxu0 %vm241_vm2, %v300_v46 }
 0x518   :  { %1592 = vmatpush3.bf16.msra.mxu0 %v422_v47  ;;  %1593 = vmatprep.mubr.msk.bf16.mxu0 %vm1946_vm1, %v1945_v15 }
 0x519   :  { %1603 = vmatprep.subr.bf16.mxu0 %v1945_v15 }
 0x51a   :  { %v1754_v48 = vpop.eup %1753 }
 0x51b   :  { %v414_v42 = vmul.f32 %v1754_v48, %v2259_v7 }
 0x51d   :  { %v415_v49 = vpack.c.bf16 %v414_v42, %v414_v42 }
 0x51f   :  { %1594 = vmatmul.mubr.msk.bf16.vlgmr.msra.gmra.mrb[8].mxu0 %vm241_vm2, %v415_v49 }
 0x520   :  { %1604 = vmatpush3.bf16.msra.mxu0 %v540_v50  ;;  %1605 = vmatprep.mubr.msk.bf16.mxu0 %vm1946_vm1, %v1945_v15 }
 0x521   :  { %1615 = vmatprep.subr.bf16.mxu0 %v1945_v15 }
 0x53c   :  { %v530_v51 = vpop.xlane.xlu0 %529 }
 0x53d   :  { %1755 = vrcp.f32 %v530_v51 }
 0x540   :  { %v653_v57 = vpop.permute.xlu0 %652 }
 0x541   :  { %v658_v59 = vsel %vm306_vm4, %v653_v57, 0 }
 0x544   :  { %v648_v53 = vpop.xlane.xlu1 %647 }
 0x545   :  { %1757 = vrcp.f32 %v648_v53 }
 0x547   :  { %v1756_v54 = vpop.eup %1755 }
 0x548   :  { %v532_v55 = vmul.f32 %v1756_v54, %v1740_v21  ;;  %v765_v56 = vpop.xlane.xlu1 %764 }
 0x549   :  { %1759 = vrcp.f32 %v765_v56 }
 0x54a   :  { %v533_v58 = vpack.c.bf16 %v532_v55, %v532_v55 }
 0x54c   :  { %1606 = vmatmul.mubr.msk.bf16.vlgmr.msra.gmra.mrb[12].mxu0 %vm241_vm2, %v533_v58  ;;  %v882_v60 = vpop.xlane.xlu1 %881 }
 0x54d   :  { %1616 = vmatpush3.bf16.msra.mxu0 %v658_v59  ;;  %1617 = vmatprep.mubr.msk.bf16.mxu0 %vm1946_vm1, %v1945_v15  ;;  %1761 = vrcp.f32 %v882_v60 }
 0x54e   :  { %1627 = vmatprep.subr.bf16.mxu0 %v1945_v15 }
 0x54f   :  { %v1758_v61 = vpop.eup %1757 }
 0x550   :  { %v650_v62 = vmul.f32 %v1758_v61, %v2267_v24  ;;  %v887_v5 = vpop.permute.xlu1 %886 }
 0x551   :  { %v892_v8 = vsel %vm306_vm4, %v887_v5, 0 }
 0x552   :  { %v651_v63 = vpack.c.bf16 %v650_v62, %v650_v62  ;;  %v1723_v62 = vld [vmem:[%s2416_s5] sm:$0xff]  }
 0x553   :  { %v1760_v2 = vpop.eup %1759  ;;  %1670 = vmatpush3.bf16.msra.mxu1 %v1723_v62 }
 0x554   :  { %1618 = vmatmul.mubr.msk.bf16.vlgmr.msra.gmra.mrb[16].mxu0 %vm241_vm2, %v651_v63  ;;  %v767_v4 = vmul.f32 %v1760_v2, %v2271_v26  ;;  %v1724_v63 = vld [vmem:[%s2416_s5 + $0x8] sm:$0xff]   ;;  %1671 = vmatprep.subr.bf16.mxu1 %v1945_v15 }
 0x555   :  { %1628 = vmatpush3.bf16.msra.mxu0 %v775_v3  ;;  %1629 = vmatprep.mubr.msk.bf16.mxu0 %vm1946_vm1, %v1945_v15 }
 0x556   :  { %1639 = vmatprep.subr.bf16.mxu0 %v1945_v15  ;;  %v768_v6 = vpack.c.bf16 %v767_v4, %v767_v4 }
 0x557   :  { %v1762_v7 = vpop.eup %1761  ;;  %1672 = vmatpush3.bf16.msra.mxu1 %v1724_v63 }
 0x558   :  { %v884_v9 = vmul.f32 %v1762_v7, %v2275_v28  ;;  %1685 = vmatprep.subr.bf16.mxu1 %v1945_v15 }
 0x55a   :  { %v885_v10 = vpack.c.bf16 %v884_v9, %v884_v9 }
 0x55c   :  { %1630 = vmatmul.mubr.msk.bf16.vlgmr.msra.gmra.mrb[20].mxu0 %vm241_vm2, %v768_v6 }
 0x55d   :  { %1640 = vmatpush3.bf16.msra.mxu0 %v892_v8  ;;  %1641 = vmatprep.mubr.msk.bf16.mxu0 %vm1946_vm1, %v1945_v15 }
 0x55e   :  { %1651 = vmatprep.subr.bf16.mxu0 %v1945_v15 }
 0x564   :  { %1642 = vmatmul.mubr.msk.bf16.vlgmr.msra.gmra.mrb[24].mxu0 %vm241_vm2, %v885_v10 }
 0x565   :  { %1653 = vmatprep.mubr.msk.bf16.mxu0 %vm1946_vm1, %v1945_v15 }
 0x571   :  { %v1001_v11 = vpop.xlane.xlu0 %1000 }
 0x572   :  { %1763 = vrcp.f32 %v1001_v11 }
 0x575   :  { %v1006_v12 = vpop.permute.xlu0 %1005 }
 0x576   :  { %v1011_v13 = vsel %vm306_vm4, %v1006_v12, 0 }
 0x577   :  { %1652 = vmatpush3.bf16.msra.mxu0 %v1011_v13 }
 0x578   :  { %1663 = vmatprep.subr.bf16.mxu0 %v1945_v15 }
 0x57c   :  { %v1764_v14 = vpop.eup %1763 }
 0x57d   :  { %v1003_v16 = vmul.f32 %v1764_v14, %v2284_v35 }
 0x57f   :  { %v1004_v17 = vpack.c.bf16 %v1003_v16, %v1003_v16  ;;  %v1503_v16 = vld [vmem:[#allocation6] ss:$0 sm:$0xff] }
 0x581   :  { %1654 = vmatmul.mubr.msk.bf16.vlgmr.msra.gmra.mrb[28].mxu0 %vm241_vm2, %v1004_v17  ;;  %v1120_v18 = vpop.xlane.xlu1 %1119 }
 0x582   :  { %1765 = vrcp.f32 %v1120_v18  ;;  %1665 = vmatprep.mubr.msk.bf16.mxu0 %vm1946_vm1, %v1945_v15 }
 0x585   :  { %v1125_v19 = vpop.permute.xlu1 %1124 }
 0x586   :  { %v1130_v20 = vsel %vm306_vm4, %v1125_v19, 0 }
 0x587   :  { %1664 = vmatpush3.bf16.msra.mxu0 %v1130_v20 }
 0x588   :  { %1677 = vmatprep.subr.bf16.mxu0 %v1945_v15 }
 0x58c   :  { %v1766_v21 = vpop.eup %1765 }
 0x58d   :  { %v1122_v22 = vmul.f32 %v1766_v21, %v2288_v41 }
 0x58f   :  { %v1123_v23 = vpack.c.bf16 %v1122_v22, %v1122_v22 }
 0x591   :  { %1666 = vmatmul.mubr.msk.bf16.vlgmr.msra.gmra.mrb[32].mxu0 %vm241_vm2, %v1123_v23 }
 0x592   :  { %1681 = vmatprep.mubr.msk.bf16.mxu0 %vm1946_vm1, %v1945_v15 }
 0x5ea   :  { %v344_v24 = vpop.f32.mrb[4].mxu0 }
 0x5eb   :  { %v350_v25 = vpack.c.bf16 %v344_v24, %v344_v24  ;;  %v1583_v26 = vpop.f32.mrb[5].mxu0 }
 0x5ec   :  { %v347_v27 = vpop.f32.mrb[6].mxu0 }
 0x5ed   :  { %352 = vst.msk [vmem:[#allocation2] sm:$0xf] %vm351_vm5, %v350_v25  ;;  %v1584_v28 = vpop.f32.mrb[7].mxu0 }
 0x5f2   :  { %v458_v29 = vpop.f32.mrb[8].mxu0 }
 0x5f3   :  { %v464_v30 = vpack.c.bf16 %v458_v29, %v458_v29  ;;  %v1595_v31 = vpop.f32.mrb[9].mxu0 }
 0x5f4   :  { %v461_v32 = vpop.f32.mrb[10].mxu0 }
 0x5f5   :  { %466 = vrot.lane.b32.xlu0 %v464_v30, %s1958_s27  ;;  %v1596_v33 = vpop.f32.mrb[11].mxu0 }
 0x61f   :  { %v576_v34 = vpop.f32.mrb[12].mxu0 }
 0x620   :  { %v582_v35 = vpack.c.bf16 %v576_v34, %v576_v34  ;;  %v1607_v36 = vpop.f32.mrb[13].mxu0 }
 0x621   :  { %v579_v37 = vpop.f32.mrb[14].mxu0  ;;  %v1726_v36 = vld [vmem:[%s2420_s9 + $0x8] sm:$0xff]  }
 0x622   :  { %584 = vrot.lane.b32.xlu0 %v582_v35, %s1959_s8  ;;  %v1608_v41 = vpop.f32.mrb[15].mxu0  ;;  %v1725_v35 = vld [vmem:[%s2420_s9] sm:$0xff]  }
 0x623   :  { %1678 = vmatpush3.bf16.msra.mxu0 %v1725_v35 }
 0x624   :  { %1679 = vmatprep.subr.bf16.mxu0 %v1945_v15 }
 0x627   :  { %v694_v38 = vpop.f32.mrb[16].mxu0  ;;  %1680 = vmatpush3.bf16.msra.mxu0 %v1726_v36 }
 0x628   :  { %v700_v39 = vpack.c.bf16 %v694_v38, %v694_v38  ;;  %v1619_v40 = vpop.f32.mrb[17].mxu0 }
 0x629   :  { %v697_v43 = vpop.f32.mrb[18].mxu0 }
 0x62a   :  { %702 = vrot.lane.b32.xlu0 %v700_v39, %s1960_s10  ;;  %v1620_v44 = vpop.f32.mrb[19].mxu0 }
 0x62f   :  { %v811_v45 = vpop.f32.mrb[20].mxu0 }
 0x630   :  { %v817_v46 = vpack.c.bf16 %v811_v45, %v811_v45  ;;  %v1631_v47 = vpop.f32.mrb[21].mxu0 }
 0x631   :  { %v814_v48 = vpop.f32.mrb[22].mxu0 }
 0x632   :  { %v819_v42 = vrot.slane %v817_v46, 4  ;;  %v1632_v49 = vpop.f32.mrb[23].mxu0  ;;  %v1507_v46 = vld [vmem:[#allocation8] ss:$0 sm:$0xff] }
 0x633   :  { %v1508_v49 = vld [vmem:[#allocation9] ss:$0 sm:$0xff] }
 0x634   :  { %822 = vst.msk [vmem:[#allocation2] sm:$0xf0] %vm821_vm6, %v819_v42 }
 0x637   :  { %v928_v50 = vpop.f32.mrb[24].mxu0 }
 0x638   :  { %v934_v51 = vpack.c.bf16 %v928_v50, %v928_v50  ;;  %v1643_v52 = vpop.f32.mrb[25].mxu0 }
 0x639   :  { %v931_v53 = vpop.f32.mrb[26].mxu0 }
 0x63a   :  { %v936_v54 = vrot.slane %v934_v51, 4  ;;  %v1644_v55 = vpop.f32.mrb[27].mxu0 }
 0x63b   :  { %v1728_v55 = vld [vmem:[%s2422_s11 + $0x8] sm:$0xff]  }
 0x63c   :  { %937 = vrot.lane.b32.xlu1 %v936_v54, %s1958_s27  ;;  %v1727_v54 = vld [vmem:[%s2422_s11] sm:$0xff]  }
 0x654   :  { %v1047_v56 = vpop.f32.mrb[28].mxu0 }
 0x655   :  { %v1053_v57 = vpack.c.bf16 %v1047_v56, %v1047_v56  ;;  %v1655_v58 = vpop.f32.mrb[29].mxu0  ;;  %v1729_v56 = vld [vmem:[%s2422_s11 + $0x10] sm:$0xff]  }
 0x656   :  { %v1050_v59 = vpop.f32.mrb[30].mxu0  ;;  %v1509_v58 = vld [vmem:[#allocation11] ss:$0 sm:$0xff] }
 0x657   :  { %v1055_v60 = vrot.slane %v1053_v57, 4  ;;  %v1656_v61 = vpop.f32.mrb[31].mxu0  ;;  %v1730_v57 = vld [vmem:[%s2422_s11 + $0x18] sm:$0xff]   ;;  %s1961_s11 = smov [#allocation14]  }
 0x658   :  { %s1466_s2 = sshll.u32 %s1961_s11, 4  ;;  %s1467_s2 = int_to_ptr.vmem [resolvable:$true] %s1466_s2 }
 0x659   :  { %1056 = vrot.lane.b32.xlu1 %v1055_v60, %s1959_s8  ;;  %s1907_s26 = scalar_lea.vmem %s1467_s2, 256  ;;  %p1912_p7 = scmp.lt.s32.totalorder %s1467_s2, %s1467_s2 }
 0x65a   :  { %p1908_p6 = scmp.ne.s32.totalorder %s1467_s2, %s1907_s26  ;;  %p1913_p8 = scmp.lt.s32.totalorder %s1907_s26, %s1907_s26 }
 0x65c   :  { %p1914_p9 = por %p1913_p8, %p1912_p7 }
 0x65e   :  { %p1915_p10 = pnand %p1914_p9, %p1908_p6 }
 0x664   :  { %v1166_v2 = vpop.f32.mrb[32].mxu0 }
 0x665   :  { %v1172_v3 = vpack.c.bf16 %v1166_v2, %v1166_v2  ;;  %v1667_v4 = vpop.f32.mrb[33].mxu0 }
 0x666   :  { %v1169_v5 = vpop.f32.mrb[34].mxu0 }
 0x667   :  { %v1174_v6 = vrot.slane %v1172_v3, 4  ;;  %v467_v7 = vpop.permute.xlu0 %466  ;;  %v1668_v8 = vpop.f32.mrb[35].mxu0 }
 0x668   :  { %470 = vst.msk [vmem:[#allocation2] sm:$0xf] %vm469_vm7, %v467_v7 }
 0x669   :  { %1175 = vrot.lane.b32.xlu1 %v1174_v6, %s1960_s10 }
 0x694   :  { %v585_v9 = vpop.permute.xlu0 %584 }
 0x695   :  { %588 = vst.msk [vmem:[#allocation2] sm:$0xf] %vm587_vm8, %v585_v9 }
 0x69c   :  { %v703_v10 = vpop.permute.xlu0 %702 }
 0x69d   :  { %706 = vst.msk [vmem:[#allocation2] sm:$0xf] %vm705_vm9, %v703_v10 }
 0x6ae   :  { %v938_v11 = vpop.permute.xlu1 %937 }
 0x6af   :  { %941 = vst.msk [vmem:[#allocation2] sm:$0xf0] %vm940_vm10, %v938_v11 }
 0x6cb   :  { %v1057_v12 = vpop.permute.xlu1 %1056 }
 0x6cc   :  { %1060 = vst.msk [vmem:[#allocation2] sm:$0xf0] %vm1059_vm11, %v1057_v12 }
 0x6db   :  { %v1176_v13 = vpop.permute.xlu1 %1175 }
 0x6dc   :  { %1179 = vst.msk [vmem:[#allocation2] sm:$0xf0] %vm1178_vm12, %v1176_v13  ;;  %v1513_v13 = vld [vmem:[#allocation12] ss:$0 sm:$0xff] }
 0x6e3   :  { %v1180_v14 = vld [vmem:[#allocation2] sm:$0xff] }
 0x6e4   :  { %1674 = vmatmul.mubr.msk.bf16.vlgmr.msra.gmra.mrb[32].mxu1 %vm118_vm0, %v1180_v14 }
 0x6e5   :  { %1693 = vmatprep.mubr.msk.bf16.mxu1 %vm1946_vm1, %v1945_v15  ;;  %1686 = vmatpush3.bf16.msra.mxu1 %v1727_v54 }
 0x6e6   :  { %1687 = vmatprep.subr.bf16.mxu1 %v1945_v15 }
 0x6e9   :  { %1688 = vmatpush3.bf16.msra.mxu1 %v1728_v55 }
 0x6ea   :  { %1689 = vmatprep.subr.bf16.mxu1 %v1945_v15 }
 0x6ed   :  { %1690 = vmatpush3.bf16.msra.mxu1 %v1729_v56 }
 0x6ee   :  { %1691 = vmatprep.subr.bf16.mxu1 %v1945_v15 }
 0x6f1   :  { %1692 = vmatpush3.bf16.msra.mxu1 %v1730_v57 }
 0x7b7   :  { %v1241_v17 = vpop.f32.mrb[32].mxu1 }
 0x7b8   :  { %v1242_v18 = vadd.f32 %v1503_v16, %v1241_v17  ;;  %v1675_v19 = vpop.f32.mrb[33].mxu1 }
 0x7b9   :  { %v1244_v20 = vpop.f32.mrb[34].mxu1 }
 0x7ba   :  { %v2358_v21 = vadd.f32 %v1242_v18, %v2108_v0  ;;  %v1245_v22 = vadd.f32 %v1503_v16, %v1244_v20  ;;  %v1676_v23 = vpop.f32.mrb[35].mxu1 }
 0x7bc   :  { %v2361_v24 = vadd.f32 %v1245_v22, %v2113_v1  ;;  %v1250_v25 = vsel %vm118_vm0, %v2358_v21, 0.0 }
 0x7bd   :  { %1251 = vadd.xlane.f32.xlu0 %v1250_v25 }
 0x7be   :  { %v1253_v26 = vsel %vm118_vm0, %v2361_v24, 0.0 }
 0x7bf   :  { %1254 = vadd.xlane.f32.xlu1 %v1253_v26 }
 0x84a   :  { %v1252_v27 = vpop.xlane.xlu0 %1251 }
 0x84b   :  { %v1256_v28 = vmul.f32 0.03125, %v1252_v27 }
 0x84c   :  { %v1255_v29 = vpop.xlane.xlu1 %1254 }
 0x84d   :  { %v1258_v30 = vsub.f32 %v2358_v21, %v1256_v28  ;;  %v1257_v0 = vmul.f32 0.03125, %v1255_v29 }
 0x84f   :  { %v1259_v31 = vsub.f32 %v2361_v24, %v1257_v0  ;;  %v1260_v32 = vmul.f32 %v1258_v30, %v1258_v30 }
 0x851   :  { %v1262_v1 = vsel %vm118_vm0, %v1260_v32, 0.0  ;;  %v1261_v33 = vmul.f32 %v1259_v31, %v1259_v31 }
 0x852   :  { %1263 = vadd.xlane.f32.xlu0 %v1262_v1 }
 0x853   :  { %v1265_v34 = vsel %vm118_vm0, %v1261_v33, 0.0 }
 0x856   :  { %1266 = vadd.xlane.f32.xlu0 %v1265_v34 }
 0x8df   :  { %v1264_v37 = vpop.xlane.xlu0 %1263 }
 0x8e0   :  { %v1268_v41 = vmul.f32 0.03125, %v1264_v37 }
 0x8e2   :  { %v1270_v38 = vadd.f32 1e-05, %v1268_v41 }
 0x8e3   :  { %v1267_v39 = vpop.xlane.xlu0 %1266 }
 0x8e4   :  { %1767 = vrsqrt.f32 %v1270_v38  ;;  %v1269_v40 = vmul.f32 0.03125, %v1267_v39 }
 0x8e6   :  { %v1271_v43 = vadd.f32 1e-05, %v1269_v40 }
 0x8e8   :  { %1769 = vrsqrt.f32 %v1271_v43 }
 0x8ee   :  { %v1768_v44 = vpop.eup %1767 }
 0x8ef   :  { %v1274_v45 = vmul.f32 %v1768_v44, %v1258_v30 }
 0x8f1   :  { %v1283_v48 = vmul.f32 %v1507_v46, %v1274_v45 }
 0x8f2   :  { %v1770_v47 = vpop.eup %1769 }
 0x8f3   :  { %v1275_v42 = vmul.f32 %v1770_v47, %v1259_v31  ;;  %v1292_v51 = vadd.f32 %v1508_v49, %v1283_v48 }
 0x8f5   :  { %v1284_v50 = vmul.f32 %v1507_v46, %v1275_v42 }
 0x8f7   :  { %v1293_v52 = vadd.f32 %v1508_v49, %v1284_v50 }
 0x8f9   :  { %v1294_v53 = vpack.c.bf16 %v1293_v52, %v1292_v51 }
 0x8fb   :  { %1682 = vmatmul.mubr.msk.bf16.vlgmr.msra.gmra.mrb[36].mxu0 %vm118_vm0, %v1294_v53 }
 0x9ce   :  { %v1355_v59 = vpop.f32.mrb[36].mxu0 }
 0x9cf   :  { %v1356_v60 = vadd.f32 %v1509_v58, %v1355_v59  ;;  %v1683_v61 = vpop.f32.mrb[37].mxu0 }
 0x9d0   :  { %v1358_v62 = vpop.f32.mrb[38].mxu0 }
 0x9d1   :  { %v1364_v63 = vmul.f32 0.70710677, %v1356_v60  ;;  %v1359_v2 = vadd.f32 %v1509_v58, %v1358_v62  ;;  %v1684_v3 = vpop.f32.mrb[39].mxu0  ;;  %v1362_v15 = vmul.f32 0.5, %v1356_v60 }
 0x9d3   :  { %1771 = verf.f32 %v1364_v63  ;;  %v1365_v4 = vmul.f32 0.70710677, %v1359_v2  ;;  %v1363_v8 = vmul.f32 0.5, %v1359_v2 }
 0x9d5   :  { %1773 = verf.f32 %v1365_v4 }
 0x9dd   :  { %v1772_v5 = vpop.eup %1771 }
 0x9de   :  { %v1368_v6 = vadd.f32 1.0, %v1772_v5 }
 0x9df   :  { %v1774_v7 = vpop.eup %1773 }
 0x9e0   :  { %v1369_v9 = vadd.f32 1.0, %v1774_v7  ;;  %v1370_v10 = vmul.f32 %v1368_v6, %v1362_v15 }
 0x9e2   :  { %v1371_v11 = vmul.f32 %v1369_v9, %v1363_v8 }
 0x9e4   :  { %v1372_v12 = vpack.c.bf16 %v1371_v11, %v1370_v10 }
 0x9e6   :  { %1694 = vmatmul.mubr.msk.bf16.vlgmr.msra.gmra.mrb[36].mxu1 %vm1412_vm13, %v1372_v12 }
 0xab9   :  { %v1450_v14 = vpop.f32.mrb[36].mxu1 }
 0xaba   :  { %v1451_v16 = vadd.f32 %v1513_v13, %v1450_v14  ;;  %v1695_v17 = vpop.f32.mrb[37].mxu1 }
 0xabb   :  { %v1453_v18 = vpop.f32.mrb[38].mxu1 }
 0xabc   :  { %v1457_v19 = vadd.f32 %v1451_v16, %v2358_v21  ;;  %v1454_v20 = vadd.f32 %v1513_v13, %v1453_v18  ;;  %v1696_v22 = vpop.f32.mrb[39].mxu1 }
 0xabe   :  { %1459 = vst.msk [vmem:[#allocation14] sm:$0xff] %vm118_vm0, %v1457_v19  ;;  %v1458_v23 = vadd.f32 %v1454_v20, %v2361_v24 }
 0xac0   :  { %1460 = vst.msk [vmem:[#allocation14 + $0x8] sm:$0xff] %vm118_vm0, %v1458_v23 }
 0xac1   :  { %1918 = shalt.err (!%p1915_p10)
}
 0xac2   :  { %s1919_s21 = scalar_lea.hbm %s2424_s13, 256 }
 0xac3   :  { %p1920_p11 = scmp.ne.s32.totalorder %s2424_s13, %s1919_s21  ;;  %p1923_p12 = scmp.lt.u32.totalorder %s1919_s21, %s2424_s13 }
 0xac5   :  { %p1925_p13 = pnand %p1923_p12, %p1920_p11 }
 0xac7   :  { %1928 = shalt.err (!%p1925_p13)
}
 0xac8   :  { %s1962_s24 = smov 128  }
 0xac9   :  { %1472 = dma.vmem_to_hbm [thread:$0]  %s1467_s2, 256, %s2424_s13, [#allocation5], %s1962_s24, %s1962_s24, %s1958_s27  }
 0xaca   :  { %1937 = dma.done.wait [#allocation5], 256  }
 0xacb   :  { %1938 = vsyncadd [#allocation5], 4294967040 }
 0xacc   :  { %1476 = vsyncpa [#allocation4], 1 }
 0xacd   :  { %1477 = vsyncpa [#allocation7], 1 }
 0xace   :  { %1478 = vsyncpa [#allocation10], 1 }
 0xacf   :  { %1479 = vsyncpa [#allocation13], 1 }
 0xad0   :  { %1480 = vsyncpa [#allocation5], 1 }

</bundles_post_ra>
